<compile_context>
chip_gen: v7x
topology: tpu7x:2x2x1
jax: 0.10.0
libtpu: 0.0.40
codegen_flags: <defaults>
</compile_context>

<pallas_src>
import functools

import jax
import jax.numpy as jnp
import numpy as np
from jax import lax
from jax.experimental import pallas as pl
from jax.experimental.pallas import tpu as pltpu


# ----------------------------------------------------------------------------
# Sizing helpers
# ----------------------------------------------------------------------------
def _vmem_budget_bytes():
    """3/4 of physical VMEM per core (48 MiB on v7x, 96 MiB on v5e/v6e)."""
    cap = 64 * 1024 * 1024
    try:
        cap = int(getattr(pltpu.get_tpu_info(), "vmem_capacity_bytes", cap))
    except Exception:
        pass
    return (cap * 3) // 4


def _divisor_tiles(dim, mult, cap):
    """Divisors of dim <= cap that are multiples of mult (or == dim), descending."""
    return [t for t in range(min(cap, dim), 0, -1)
            if dim % t == 0 and (t % mult == 0 or t == dim)]


# ----------------------------------------------------------------------------
# Kernel 1: tiled embedding matmul  (M, K) @ (K, N) -> (M, N), f32 output
# ----------------------------------------------------------------------------
def _embed_matmul_kernel(x_ref, w_ref, o_ref):
    @pl.when(pl.program_id(2) == 0)
    def _init():
        o_ref[...] = jnp.zeros_like(o_ref)

    # Output tile is f32 and resident across the k axis -> accumulate in place.
    o_ref[...] += jnp.dot(x_ref[...], w_ref[...],
                          preferred_element_type=jnp.float32)


def _pick_embed_tiles(M, K, N, tile_budget_bytes):
    tms = _divisor_tiles(M, 8, M)        # prefer tm == M: weight streamed once
    tns = _divisor_tiles(N, 128, 512)
    tks = _divisor_tiles(K, 128, 2048)
    for tm in tms:                        # priority: tm, then tn, then tk
        for tn in tns:
            for tk in tks:
                # double-buffered x/w tiles + revolving output tile (f32)
                if 8 * (tm * tk + tk * tn + tm * tn) <= tile_budget_bytes:
                    return tm, tn, tk
    return tms[-1], tns[-1], tks[-1]


def embed(x_flat, w, *, vmem_limit_bytes):
    M, K = x_flat.shape
    K2, N = w.shape
    assert K == K2
    assert N % 128 == 0 and K % 128 == 0, "pad feature dims to multiples of 128"
    tm, tn, tk = _pick_embed_tiles(M, K, N, tile_budget_bytes=vmem_limit_bytes // 2)
    grid = (M // tm, N // tn, K // tk)

    cost = pl.CostEstimate(
        flops=2 * M * K * N,
        transcendentals=0,
        bytes_accessed=4 * (M * K * (N // tn) + K * N * (M // tm) + M * N),
    )
    return pl.pallas_call(
        _embed_matmul_kernel,
        out_shape=jax.ShapeDtypeStruct((M, N), jnp.float32),
        grid_spec=pltpu.PrefetchScalarGridSpec(
            num_scalar_prefetch=0,
            grid=grid,
            in_specs=[
                pl.BlockSpec((tm, tk), lambda i, j, k: (i, k)),
                pl.BlockSpec((tk, tn), lambda i, j, k: (k, j)),
            ],
            out_specs=pl.BlockSpec((tm, tn), lambda i, j, k: (i, j)),
        ),
        compiler_params=pltpu.CompilerParams(
            dimension_semantics=("parallel", "parallel", "arbitrary"),
            vmem_limit_bytes=vmem_limit_bytes,
        ),
        cost_estimate=cost,
    )(x_flat, w)


# ----------------------------------------------------------------------------
# Kernel 2: VICReg loss on embeddings x, y of shape (B, D) -> scalar (1, 1)
#
# 1-D grid over the n(n+1)/2 upper-triangular feature-tile pairs (i, j >= i),
# driven by scalar-prefetched index tables.  Each step computes one (td, td)
# covariance block for x and y (batch contraction on the MXU, no transpose, no
# full (D, D) matrix resident) and folds its square into a (td, td) VMEM
# accumulator (pure VPU); off-diagonal blocks count twice (symmetry).  Each
# row's diagonal step also centers the row-resident tiles into VMEM scratch and
# accumulates the MSE / std-hinge / cov-diagonal partials into (1, td) vector
# accumulators.  The single scalarization happens in the finalize step.
# ----------------------------------------------------------------------------
def _vicreg_loss_kernel(
    ii_ref, jj_ref,                          # scalar-prefetch index tables (SMEM)
    xi_ref, xj_ref, yi_ref, yj_ref,          # (B, td) feature tiles
    o_ref,                                   # (1, 1) scalar loss (SMEM)
    xim_sc, yim_sc,                          # (B, td) centered row-resident tiles
    cov_acc,                                 # (td, td) weighted sum of cov^2
    hinge_acc, diag_acc, mse_acc,            # (1, td) vector partial sums
    *, batch_size, num_features, n_rows, n_cols,
    sim_coeff, std_coeff, cov_coeff,
):
    t = pl.program_id(0)
    nt = pl.num_programs(0)
    i_blk = ii_ref[t]
    j_blk = jj_ref[t]
    is_diag = i_blk == j_blk

    inv_b = jnp.float32(1.0 / n_rows)
    inv_bm1_var = jnp.float32(1.0 / (n_rows - 1))      # torch.var(dim=0), unbiased
    inv_bm1_cov = jnp.float32(1.0 / (batch_size - 1))  # cov uses args.batch_size

    @pl.when(t == 0)
    def _init():
        cov_acc[...] = jnp.zeros_like(cov_acc)
        hinge_acc[...] = jnp.zeros_like(hinge_acc)
        diag_acc[...] = jnp.zeros_like(diag_acc)
        mse_acc[...] = jnp.zeros_like(mse_acc)

    # Each row i starts with its diagonal tile (j == i): hoist centering of the
    # row-resident x/y tiles into VMEM scratch and do all diagonal-only work.
    @pl.when(is_diag)
    def _row_start_and_diag():
        xi = xi_ref[...].astype(jnp.float32)
        yi = yi_ref[...].astype(jnp.float32)
        xim = xi - jnp.sum(xi, axis=0, keepdims=True) * inv_b
        yim = yi - jnp.sum(yi, axis=0, keepdims=True) * inv_b
        xim_sc[...] = xim
        yim_sc[...] = yim

        # per-feature centered sum of squares (std hinge AND cov diagonal)
        ssq_x = jnp.sum(xim * xim, axis=0, keepdims=True)
        ssq_y = jnp.sum(yim * yim, axis=0, keepdims=True)
        std_x = jnp.sqrt(ssq_x * inv_bm1_var + 1e-4)
        std_y = jnp.sqrt(ssq_y * inv_bm1_var + 1e-4)
        hinge_acc[...] += (jnp.maximum(1.0 - std_x, 0.0)
                           + jnp.maximum(1.0 - std_y, 0.0))
        diag_x = ssq_x * inv_bm1_cov
        diag_y = ssq_y * inv_bm1_cov
        diag_acc[...] += diag_x * diag_x + diag_y * diag_y

        d = xi - yi
        mse_acc[...] += jnp.sum(d * d, axis=0, keepdims=True)

    # (td, td) covariance block (i_blk, j_blk) via batch contraction (no
    # transpose materialized).  Only j >= i is visited -> off-diag blocks x2.
    xjm = xj_ref[...].astype(jnp.float32)
    yjm = yj_ref[...].astype(jnp.float32)
    xjm = xjm - jnp.sum(xjm, axis=0, keepdims=True) * inv_b
    yjm = yjm - jnp.sum(yjm, axis=0, keepdims=True) * inv_b

    dn = (((0,), (0,)), ((), ()))
    cov_x = lax.dot_general(xim_sc[...], xjm, dn,
                            preferred_element_type=jnp.float32) * inv_bm1_cov
    cov_y = lax.dot_general(yim_sc[...], yjm, dn,
                            preferred_element_type=jnp.float32) * inv_bm1_cov
    weight = jnp.float32(2.0) - (i_blk == j_blk).astype(jnp.float32)
    cov_acc[...] += (cov_x * cov_x + cov_y * cov_y) * weight   # pure VPU add

    @pl.when(t == nt - 1)
    def _finalize():
        repr_loss = jnp.sum(mse_acc[...]) / jnp.float32(n_rows * n_cols)
        std_loss = jnp.sum(hinge_acc[...]) / jnp.float32(n_cols) * jnp.float32(0.5)
        cov_loss = ((jnp.sum(cov_acc[...]) - jnp.sum(diag_acc[...]))
                    / jnp.float32(num_features))
        o_ref[0, 0] = (
            jnp.float32(sim_coeff) * repr_loss
            + jnp.float32(std_coeff) * std_loss
            + jnp.float32(cov_coeff) * cov_loss
        )


def _pick_loss_tile(B, D, tile_budget_bytes):
    for td in _divisor_tiles(D, 128, 512):
        est = 4 * (8 * B * td      # four double-buffered (B, td) input tiles
                   + 4 * B * td    # centered row scratch + j-side temporaries
                   + 3 * td * td   # cov_acc + cov_x/cov_y blocks
                   + 8 * td)       # small vector accumulators
        if est <= tile_budget_bytes:
            return td
    return _divisor_tiles(D, 128, 512)[-1]


def vicreg_loss(x_emb, y_emb, *, batch_size, num_features,
                sim_coeff, std_coeff, cov_coeff, vmem_limit_bytes):
    B, D = x_emb.shape
    assert D % 128 == 0, "feature dim must be a multiple of 128 (pad if needed)"
    td = _pick_loss_tile(B, D, tile_budget_bytes=vmem_limit_bytes // 2)
    n = D // td
    n_steps = n * (n + 1) // 2

    # Upper-triangular (i, j >= i) tile sweep; each row starts with its diagonal
    # tile so the row-resident centering scratch is valid before first use.
    ii_list, jj_list = [], []
    for i in range(n):
        for j in range(i, n):
            ii_list.append(i)
            jj_list.append(j)
    ii = jnp.asarray(ii_list, dtype=jnp.int32)
    jj = jnp.asarray(jj_list, dtype=jnp.int32)

    kernel = functools.partial(
        _vicreg_loss_kernel,
        batch_size=batch_size, num_features=num_features,
        n_rows=B, n_cols=D,
        sim_coeff=sim_coeff, std_coeff=std_coeff, cov_coeff=cov_coeff,
    )
    spec_i = pl.BlockSpec((B, td), lambda t, ii_r, jj_r: (0, ii_r[t]))
    spec_j = pl.BlockSpec((B, td), lambda t, ii_r, jj_r: (0, jj_r[t]))

    cost = pl.CostEstimate(
        flops=4 * B * td * td * n_steps + 8 * td * td * n_steps,
        transcendentals=2 * D,
        bytes_accessed=4 * (4 * B * td * n_steps) + 4,
    )
    out = pl.pallas_call(
        kernel,
        out_shape=jax.ShapeDtypeStruct((1, 1), jnp.float32),
        grid_spec=pltpu.PrefetchScalarGridSpec(
            num_scalar_prefetch=2,
            grid=(n_steps,),
            in_specs=[spec_i, spec_j, spec_i, spec_j],
            out_specs=pl.BlockSpec(memory_space=pltpu.MemorySpace.SMEM),
            scratch_shapes=[
                pltpu.VMEM((B, td), jnp.float32),   # xim_sc
                pltpu.VMEM((B, td), jnp.float32),   # yim_sc
                pltpu.VMEM((td, td), jnp.float32),  # cov_acc
                pltpu.VMEM((1, td), jnp.float32),   # hinge_acc
                pltpu.VMEM((1, td), jnp.float32),   # diag_acc
                pltpu.VMEM((1, td), jnp.float32),   # mse_acc
            ],
        ),
        # NOTE: the carried VMEM accumulators require strictly sequential grid
        # execution -> this single axis must stay "arbitrary".
        # TODO(synk): v7x two-TensorCore variant (per-core partial accumulators
        #             + tiny epilogue combine) not implemented.
        compiler_params=pltpu.CompilerParams(
            dimension_semantics=("arbitrary",),
            vmem_limit_bytes=vmem_limit_bytes,
        ),
        cost_estimate=cost,
    )(ii, jj, x_emb, x_emb, y_emb, y_emb)
    return out[0, 0]


# ----------------------------------------------------------------------------
# Full VICReg forward (glue in plain JAX, hot paths in Pallas)
# ----------------------------------------------------------------------------
def vicreg_forward(x_img, y_img, w_embed, *, sim_coeff, std_coeff, cov_coeff):
    B = x_img.shape[0]
    vmem_limit = _vmem_budget_bytes()
    # Fuse both views into ONE (2B, F_in) matmul: weight streamed from HBM once,
    # MXU sees a 2x deeper M dimension.
    xy_flat = jnp.concatenate([x_img.reshape(B, -1), y_img.reshape(B, -1)], axis=0)
    emb = embed(xy_flat, w_embed, vmem_limit_bytes=vmem_limit)
    x_emb = emb[:B]
    y_emb = emb[B:]
    D = x_emb.shape[1]
    # TODO(synk): embeddings still round-trip HBM once between the two kernels;
    #             a fully fused embed+loss kernel is left for a future revision.
    return vicreg_loss(
        x_emb, y_emb,
        batch_size=B,          # PyTorch uses args.batch_size; identical here.
        num_features=D,        # analog of self.num_features (=4608) at small scale
        sim_coeff=sim_coeff, std_coeff=std_coeff, cov_coeff=cov_coeff,
        vmem_limit_bytes=vmem_limit,
    )


# ----------------------------------------------------------------------------
# Pure-JAX reference (mirrors the PyTorch math) for a silent correctness check
# ----------------------------------------------------------------------------
def _reference(x_img, y_img, w_embed, *, sim_coeff, std_coeff, cov_coeff):
    B = x_img.shape[0]
    x = x_img.reshape(B, -1) @ w_embed
    y = y_img.reshape(B, -1) @ w_embed
    D = x.shape[1]
    repr_loss = jnp.mean((x - y) ** 2)
    xm = x - x.mean(axis=0)
    ym = y - y.mean(axis=0)
    std_x = jnp.sqrt(jnp.var(xm, axis=0, ddof=1) + 1e-4)
    std_y = jnp.sqrt(jnp.var(ym, axis=0, ddof=1) + 1e-4)
    std_loss = (
        jnp.mean(jax.nn.relu(1.0 - std_x)) / 2.0
        + jnp.mean(jax.nn.relu(1.0 - std_y)) / 2.0
    )
    cov_x = xm.T @ xm / (B - 1)
    cov_y = ym.T @ ym / (B - 1)
    eye = jnp.eye(D, dtype=bool)
    cov_loss = jnp.sum(jnp.where(eye, 0.0, cov_x) ** 2) / D + jnp.sum(
        jnp.where(eye, 0.0, cov_y) ** 2
    ) / D
    return sim_coeff * repr_loss + std_coeff * std_loss + cov_coeff * cov_loss


if __name__ == "__main__":
    # Small, NCHW image-like inputs (two augmented views), deterministic.
    # D = 768 exercises the multi-tile (upper-triangular) covariance path.
    B, C, H, W = 8, 3, 16, 16
    D = 768
    sim_coeff, std_coeff, cov_coeff = 25.0, 25.0, 1.0

    key = jax.random.PRNGKey(0)
    kx, ky, kw = jax.random.split(key, 3)
    x_img = jax.random.normal(kx, (B, C, H, W), dtype=jnp.float32)
    y_img = x_img + 0.1 * jax.random.normal(ky, (B, C, H, W), dtype=jnp.float32)
    F_in = C * H * W
    w_embed = (
        jax.random.normal(kw, (F_in, D), dtype=jnp.float32) / np.sqrt(F_in)
    ).astype(jnp.float32)

    loss = vicreg_forward(
        x_img, y_img, w_embed,
        sim_coeff=sim_coeff, std_coeff=std_coeff, cov_coeff=cov_coeff,
    )
    loss = jax.block_until_ready(loss)

    ref = _reference(
        x_img, y_img, w_embed,
        sim_coeff=sim_coeff, std_coeff=std_coeff, cov_coeff=cov_coeff,
    )
    assert np.allclose(np.asarray(loss), np.asarray(ref), rtol=2e-3, atol=2e-3), (
        loss, ref,
    )
    print("KERNEL_OK")
</pallas_src>

<mosaic_0001>
module attributes {stable_mosaic.version = 11 : i64} {
  func.func @_embed_matmul_kernel(%arg0: i32, %arg1: i32, %arg2: i32, %arg3: memref<16x768xf32, #tpu.memory_space<vmem>>, %arg4: memref<768x384xf32, #tpu.memory_space<vmem>>, %arg5: memref<16x384xf32, #tpu.memory_space<vmem>>) attributes {dimension_semantics = [#tpu.dimension_semantics<parallel>, #tpu.dimension_semantics<parallel>, #tpu.dimension_semantics<arbitrary>], iteration_bounds = array<i64: 1, 2, 1>, scalar_prefetch = 0 : i64, scratch_operands = 0 : i64, tpu.core_type = #tpu.core_type<tc>, window_params = [{transform_indices = @transform_0, window_bounds = array<i64: 16, 768>}, {transform_indices = @transform_1, window_bounds = array<i64: 768, 384>}, {transform_indices = @transform_2, window_bounds = array<i64: 16, 384>}]} {
    %c0_i32 = arith.constant 0 : i32
    %0 = arith.cmpi eq, %arg2, %c0_i32 : i32
    %1 = arith.extui %0 : i1 to i32
    %c0_i32_0 = arith.constant 0 : i32
    %2 = arith.cmpi ne, %1, %c0_i32_0 : i32
    scf.if %2 {
      %cst_8 = arith.constant 0.000000e+00 : f32
      %9 = vector.broadcast %cst_8 : f32 to vector<16x384xf32>
      %c0_9 = arith.constant 0 : index
      %c0_10 = arith.constant 0 : index
      %10 = vector.load %arg5[%c0_9, %c0_10] : memref<16x384xf32, #tpu.memory_space<vmem>>, vector<16x384xf32>
      tpu.vector_store %arg5[%c0_9, %c0_10], %9 {strides = array<i32>} : memref<16x384xf32, #tpu.memory_space<vmem>>, vector<16x384xf32>,
    } else {
    }
    %c0 = arith.constant 0 : index
    %c0_1 = arith.constant 0 : index
    %3 = vector.load %arg5[%c0, %c0_1] : memref<16x384xf32, #tpu.memory_space<vmem>>, vector<16x384xf32>
    %c0_2 = arith.constant 0 : index
    %c0_3 = arith.constant 0 : index
    %4 = vector.load %arg3[%c0_2, %c0_3] : memref<16x768xf32, #tpu.memory_space<vmem>>, vector<16x768xf32>
    %c0_4 = arith.constant 0 : index
    %c0_5 = arith.constant 0 : index
    %5 = vector.load %arg4[%c0_4, %c0_5] : memref<768x384xf32, #tpu.memory_space<vmem>>, vector<768x384xf32>
    %cst = arith.constant dense<0.000000e+00> : vector<16x384xf32>
    %6 = tpu.matmul %4, %5, %cst {dimension_numbers = #tpu.dot_dimension_numbers<[1], [0], [0], [1], [0, 0, 1, 1], [], []>} : vector<16x768xf32>, vector<768x384xf32>, vector<16x384xf32> -> vector<16x384xf32>
    %7 = arith.addf %3, %6 : vector<16x384xf32>
    %c0_6 = arith.constant 0 : index
    %c0_7 = arith.constant 0 : index
    %8 = vector.load %arg5[%c0_6, %c0_7] : memref<16x384xf32, #tpu.memory_space<vmem>>, vector<16x384xf32>
    tpu.vector_store %arg5[%c0_6, %c0_7], %7 {strides = array<i32>} : memref<16x384xf32, #tpu.memory_space<vmem>>, vector<16x384xf32>,
    return
  }
  func.func @transform_0(%arg0: i32, %arg1: i32, %arg2: i32) -> (i32, i32) {
    %c0_i32 = arith.constant 0 : i32
    return %arg0, %arg2 : i32, i32
  }
  func.func @transform_1(%arg0: i32, %arg1: i32, %arg2: i32) -> (i32, i32) {
    %c0_i32 = arith.constant 0 : i32
    return %arg2, %arg1 : i32, i32
  }
  func.func @transform_2(%arg0: i32, %arg1: i32, %arg2: i32) -> (i32, i32) {
    %c0_i32 = arith.constant 0 : i32
    return %arg0, %arg1 : i32, i32
  }
}

</mosaic_0001>

<bundles_post_ra>
// kernel: tpu_custom_call.1
= control target key start
LH: loop header
LB: loop body
LE: loop exit
PB: predicated region body
PF: predicated region fallthrough
CT: control target
= control target key end

     0   :  { %7 = vsyncpa [#allocation3], 0  ;;  %s2390_s0 = inlined_call_operand.hbm [shape: f32[16,768], index: 0, kind: input, shape index: {}]   ;;  %s2391_s1 = inlined_call_operand.hbm [shape: f32[768,768], index: 1, kind: input, shape index: {}]   ;;  %s2392_s2 = inlined_call_operand.hbm [shape: f32[16,768], index: 2, kind: output, shape index: {}]  }
   0x1   :  { %8 = vsyncpa [#allocation6], 0 }
   0x2   :  { %10 = vsyncpa [#allocation6 + $0x1], 0 }
   0x3   :  { %11 = vsyncpa [#allocation4], 0 }
   0x4   :  { %13 = vsyncpa [#allocation4 + $0x1], 0  ;;  %s1824_s9 = smov 0   ;;  %s1826_s10 = smov 0  }
   0x5   :  { %s1828_s11 = smov 0   ;;  %s1830_s12 = smov 0  }
   0x6   :  { %s1832_s13 = smov 0   ;;  %s1834_s14 = smov 0  }
   0x7 LB: > { %s1130_s15 = sadd.s32 4294967295, %s1797_s14   ;;  %s1131_s16 = sadd.s32 4294967294, %s1797_s14   ;;  %s1797_s14 = sphi %s1834_s14, %s19_s14   ;;  %s1793_s13 = sphi %s1832_s13, %s2420_s13   ;;  %s1789_s12 = sphi %s1830_s12, %s2419_s12   ;;  %s1785_s11 = sphi %s1828_s11, %s2418_s11   ;;  %s1781_s10 = sphi %s1826_s10, %s2417_s10   ;;  %s1777_s9 = sphi %s1824_s9, %s2416_s9  }
   0x8   : > { %s75_s17 = sadd.s32 1, %s1785_s11  ;;  %p82_p0 = scmp.ne.s32.totalorder %s1785_s11, %s1781_s10 }
   0x9   : > { %p83_p1 = scmp.eq.s32.totalorder %s1797_s14, 0  ;;  %p88_p2 = scmp.ne.s32.totalorder %s1781_s10, %s1777_s9 }
   0xa   : > { %p1862_p3 = scmp.eq.s32.totalorder %s1130_s15, 0  ;;  %p114_p4 = scmp.eq.s32.totalorder %s1130_s15, 1 }
   0xb   : > { %p1866_p5 = por %p83_p1, %p82_p0  ;;  %p120_p6 = scmp.eq.s32.totalorder %s1131_s16, 1 }
   0xc   : > { %s2399_s18 = scalar_select %p1862_p3, 1, 0 }
   0xd   : > { %p1872_p7 = por %p1862_p3, %p88_p2  ;;  %p1876_p8 = por %p114_p4, %p82_p0 }
   0xe   : > { %p1880_p9 = por %p120_p6, %p88_p2  ;;  %p1132_p10 = scmp.ge.s32.totalorder %s1797_s14, 1 }
   0xf   : > { %s2401_s20 = scalar_select %p1872_p7, 1, 0 }
  0x10   : > { %s2402_s21 = scalar_select %p1876_p8, 1, 0 }
  0x11   : > { %s2403_s22 = scalar_select %p1880_p9, 1, 0 }
  0x12   : > { %p127_p11 = scmp.lt.s32.totalorder %s1797_s14, 3  ;;  %s1799_s24 = smov [#allocation2]  }
  0x13   : > { %s145_s25 = sshll.u32 %s1799_s24, 4  ;;  %p1593_p1 = scmp.lt.s32.totalorder %s1797_s14, 2  ;;  %s1890_s25 = int_to_ptr.vmem [resolvable:$true] %s145_s25 }
  0x14   : > { %p1886_p12 = pnand %p1132_p10, %p127_p11  ;;  %s34_s28 = sadd.s32 1, %s1793_s13 }
  0x15   : > { %p1904_p4 = pnand %p1593_p1, %p1866_p5  ;;  %p1909_p6 = scmp.ge.s32.totalorder %s34_s28, 2 }
  0x16   : > { %s2404_s23 = scalar_select %p1886_p12, 1, 0 }
  0x17   : > { %p1580_p13 = pneg %p1886_p12  ;;  %s1653_s4 = scalar_lea.hbm %s2390_s0, 1536 }
  0x18   : > { %s2406_s27 = scalar_select %p1904_p4, 1, 0 }
  0x19   : > { %p1898_p2 = pnand %p1580_p13, %p1862_p3  ;;  %p1654_p10 = scmp.ne.s32.totalorder %s2390_s0, %s1653_s4 }
  0x1a   : > { %s2407_s29 = scalar_select %p1909_p6, 1, 0 }
  0x1b   : > { %p1655_p11 = pneg %p1898_p2  ;;  %p1660_p1 = scmp.lt.u32.totalorder %s1653_s4, %s2390_s0 }
  0x1d   : > { %p1656_p13 = pnand %p1655_p11, %p1654_p10 }
  0x1f   : > { %p1657_p5 = pneg %p1656_p13 }
  0x21   : > { %p1662_p0 = pnand %p1660_p1, %p1657_p5 }
  0x23   : > { %1665 = shalt.err (!%p1662_p0)
}
  0x24   : > { %s1666_s15 = scalar_lea.vmem %s1890_s25, 1536  ;;  %p1674_p3 = scmp.lt.s32.totalorder %s1890_s25, %s1890_s25 }
  0x25   : > { %p1667_p9 = scmp.ne.s32.totalorder %s1890_s25, %s1666_s15  ;;  %p1675_p12 = scmp.lt.s32.totalorder %s1666_s15, %s1666_s15 }
  0x27   : > { %p1669_p8 = pnand %p1667_p9, %p1655_p11  ;;  %p1676_p4 = por %p1675_p12, %p1674_p3 }
  0x29   : > { %p1670_p7 = pneg %p1669_p8 }
  0x2b   : > { %p1677_p6 = pnand %p1676_p4, %p1670_p7 }
  0x2d   : > { %1680 = shalt.err (!%p1677_p6)
}
  0x2e   : > { %s1800_s16 = smov 768   ;;  %s1801_s19 = smov 48  }
  0x2f   : > { %1583 = dma.hbm_to_vmem [thread:$0]  (!%p1898_p2), %s2390_s0, 1536, %s1890_s25, [#allocation3], %s1800_s16, %s1800_s16, %s1801_s19  }
  0x30   : > { %s159_s3 = sand.u32 1, %s1785_s11   ;;  %p2408_p3 = scmp.ne.s32.totalorder %s2407_s29, 0 }
  0x31   : > { %s1569_s4 = smul.u32 2304, %s159_s3  ;;  %s1956_s19 = scalar_lea.sflag [#allocation6], %s159_s3 }
  0x32   : > { %s2422_s28 = smov (%p2408_p3, %s34_s28), 0  ;;  %s1141_s6 = smul.u32 384, %s1793_s13 }
  0x33   : > { %s71_s5 = ssub.s32 %s1793_s13, %s2422_s28  ;;  %s163_s25 = scalar_lea.vmem [#allocation5], %s1569_s4 }
  0x34   : > { %p73_p7 = scmp.eq.s32.totalorder %s71_s5, 0  ;;  %s1947_s26 = scalar_lea.hbm %s2391_s1, %s1141_s6 }
  0x35   : > { %s173_s15 = sshll.u32 %s163_s25, 4  ;;  %s1681_s24 = scalar_lea.hbm %s1947_s26, 36864  ;;  %s1954_s15 = int_to_ptr.vmem [resolvable:$true] %s173_s15 }
  0x36   : > { %s1952_s29 = scalar_select %p73_p7, %s1785_s11, %s75_s17  }
  0x37   : > { %p1682_p8 = scmp.ne.s32.totalorder %s1947_s26, %s1681_s24  ;;  %p2409_p9 = scmp.ne.s32.totalorder %s2406_s27, 0 }
  0x38   : > { %s1686_s4 = scalar_lea.hbm %s2391_s1, 73728  ;;  %p1687_p4 = scmp.lt.u32.totalorder %s1947_s26, %s2391_s1 }
  0x39   : > { %p1683_p12 = pneg %p2409_p9  ;;  %p1688_p6 = scmp.lt.u32.totalorder %s1686_s4, %s1681_s24 }
  0x3a   : > { %p1690_p11 = scmp.lt.u32.totalorder %s1681_s24, %s1947_s26 }
  0x3b   : > { %p1684_p0 = pnand %p1683_p12, %p1682_p8  ;;  %p1689_p10 = por %p1688_p6, %p1687_p4 }
  0x3d   : > { %p1685_p2 = pneg %p1684_p0  ;;  %p1691_p13 = por %p1690_p11, %p1689_p10 }
  0x3f   : > { %p1692_p5 = pnand %p1691_p13, %p1685_p2 }
  0x41   : > { %1695 = shalt.err (!%p1692_p5)
}
  0x42   : > { %s1696_s17 = scalar_lea.vmem %s1954_s15, 36864  ;;  %s1802_s3 = smov [#allocation5]  }
  0x43   : > { %p1697_p1 = scmp.ne.s32.totalorder %s1954_s15, %s1696_s17  ;;  %s1701_s8 = sshll.u32 %s1802_s3, 4  ;;  %s1702_s8 = int_to_ptr.vmem [resolvable:$false] %s1701_s8 }
  0x44   : > { %s1703_s25 = scalar_lea.vmem %s1702_s8, 73728  ;;  %p1704_p8 = scmp.lt.s32.totalorder %s1954_s15, %s1702_s8 }
  0x45   : > { %p1699_p3 = pnand %p1697_p1, %p1683_p12  ;;  %p1705_p0 = scmp.lt.s32.totalorder %s1703_s25, %s1696_s17 }
  0x47   : > { %p1700_p7 = pneg %p1699_p3  ;;  %p1706_p4 = por %p1705_p0, %p1704_p8 }
  0x49   : > { %p1707_p6 = pnand %p1706_p4, %p1700_p7 }
  0x4b   : > { %1710 = shalt.err (!%p1707_p6)
}
  0x4c   : > { %s1803_s24 = smov 384   ;;  %s1804_s30 = smov 24  }
  0x4d   : > { %1587 = dma.hbm_to_vmem [thread:$0]  (!%p2409_p9), %s1947_s26, 36864, %s1954_s15, %s1956_s19, %s1800_s16, %s1803_s24, %s1804_s30  }
  0x4e   : > { %p2410_p12 = scmp.ne.s32.totalorder %s2404_s23, 0 }
  0x4f   : > { %p2411_p2 = scmp.ne.s32.totalorder (!%p2410_p12), %s2399_s18, 0 }
  0x50   : > { %185 = sbr.rel (%p2410_p12) target bundleno = 491 (0x1eb), region = 28 }
  0x57   : > { %1764 = dma.done.wait (%p2411_p2), [#allocation3], 1536  }
  0x58   : > { %1766 = vsyncadd (%p2411_p2), [#allocation3], 4294965760  ;;  %s1992_s5 = sand.u32 1, %s1781_s10   ;;  %p2412_p9 = scmp.ne.s32.totalorder %s2401_s20, 0 }
  0x59   : > { %s1570_s4 = smul.u32 2304, %s1992_s5  ;;  %s192_s6 = scalar_lea.sflag [#allocation6], %s1992_s5 }
  0x5b   : > { %s1996_s27 = scalar_lea.vmem [#allocation5], %s1570_s4 }
  0x5c   : > { %1768 = dma.done.wait (%p2412_p9), %s192_s6, 36864  }
  0x5d   : > { %1770 = vsyncadd (%p2412_p9), %s192_s6, 4294930432  ;;  %v251_v0 = vld [vmem:[%s1996_s27 + $0x8] sm:$0xff]  ;;  %v254_v1 = vld [vmem:[%s1996_s27 + $0x20] sm:$0xff]  ;;  %s1571_s18 = smul.u32 48, %s1992_s5  ;;  %s1007_s7 = scalar_lea.sflag [#allocation4], %s1992_s5 }
  0x5e   : > { %v347_v2 = vld [vmem:[%s1996_s27 + $0x308] sm:$0xff]  ;;  %v1257_v3 = vpack.c.bf16 %v254_v1, %v251_v0  ;;  %v350_v4 = vld [vmem:[%s1996_s27 + $0x320] sm:$0xff]  ;;  %v253_v6 = vld [vmem:[%s1996_s27 + $0x18] sm:$0xff]  ;;  %s1142_s23 = smul.u32 384, %s1789_s12  ;;  %p2413_p11 = scmp.ne.s32.totalorder %s2402_s21, 0 }
  0x5f   : > { %v250_v5 = vld [vmem:[%s1996_s27] sm:$0xff]  ;;  %v1321_v7 = vpack.c.bf16 %v350_v4, %v347_v2  ;;  %v349_v10 = vld [vmem:[%s1996_s27 + $0x318] sm:$0xff]  ;;  %v260_v13 = vld [vmem:[%s1996_s27 + $0x50] sm:$0xff]  ;;  %s215_s20 = scalar_lea.vmem [#allocation7], %s1571_s18  ;;  %s1805_s17 = smov [#allocation7]  }
  0x60   : > { %v1259_v8 = vpack.c.bf16 %v253_v6, %v250_v5  ;;  %v346_v9 = vld [vmem:[%s1996_s27 + $0x300] sm:$0xff]  ;;  %v257_v11 = vld [vmem:[%s1996_s27 + $0x38] sm:$0xff]  ;;  %1258 = vmatprep.subr.bf16.mxu1 %v1257_v3  ;;  %v356_v15 = vld [vmem:[%s1996_s27 + $0x350] sm:$0xff]  ;;  %s1023_s16 = sshll.u32 %s215_s20, 4  ;;  %s2339_s19 = scalar_lea.hbm %s2392_s2, %s1142_s23  ;;  %s2341_s16 = int_to_ptr.vmem [resolvable:$true] %s1023_s16 }
  0x61   : > { %v1323_v12 = vpack.c.bf16 %v349_v10, %v346_v9  ;;  %v353_v14 = vld [vmem:[%s1996_s27 + $0x338] sm:$0xff]  ;;  %1322 = vmatprep.subr.bf16.mxu0 %v1321_v7  ;;  %v1261_v16 = vpack.c.bf16 %v260_v13, %v257_v11  ;;  %v256_v18 = vld [vmem:[%s1996_s27 + $0x30] sm:$0xff]  ;;  %v259_v19 = vld [vmem:[%s1996_s27 + $0x48] sm:$0xff]  ;;  %s1711_s12 = scalar_lea.vmem %s2341_s16, 768  ;;  %s1715_s3 = sshll.u32 %s1805_s17, 4  ;;  %s1716_s3 = int_to_ptr.vmem [resolvable:$false] %s1715_s3 }
  0x62   : > { %1260 = vmatpush1.bf16.msra.mxu1 %v1259_v8  ;;  %v1325_v17 = vpack.c.bf16 %v356_v15, %v353_v14  ;;  %v352_v20 = vld [vmem:[%s1996_s27 + $0x330] sm:$0xff]  ;;  %v1263_v21 = vpack.c.bf16 %v259_v19, %v256_v18  ;;  %v355_v22 = vld [vmem:[%s1996_s27 + $0x348] sm:$0xff]  ;;  %v266_v24 = vld [vmem:[%s1996_s27 + $0x80] sm:$0xff]  ;;  %p1712_p10 = scmp.ne.s32.totalorder %s2341_s16, %s1711_s12  ;;  %s1717_s8 = scalar_lea.vmem %s1716_s3, 1536 }
  0x63   : > { %1324 = vmatpush1.bf16.msra.mxu0 %v1323_v12  ;;  %v263_v23 = vld [vmem:[%s1996_s27 + $0x68] sm:$0xff]  ;;  %1262 = vmatprep.subr.bf16.mxu1 %v1261_v16  ;;  %v1327_v25 = vpack.c.bf16 %v355_v22, %v352_v20  ;;  %v362_v28 = vld [vmem:[%s1996_s27 + $0x380] sm:$0xff]  ;;  %v265_v31 = vld [vmem:[%s1996_s27 + $0x78] sm:$0xff]  ;;  %p1718_p1 = scmp.lt.s32.totalorder %s2341_s16, %s1716_s3  ;;  %p1719_p3 = scmp.lt.s32.totalorder %s1717_s8, %s1711_s12 }
  0x64   : > { %1326 = vmatprep.subr.bf16.mxu0 %v1325_v17  ;;  %v1265_v26 = vpack.c.bf16 %v266_v24, %v263_v23  ;;  %v359_v27 = vld [vmem:[%s1996_s27 + $0x368] sm:$0xff]  ;;  %v262_v29 = vld [vmem:[%s1996_s27 + $0x60] sm:$0xff]  ;;  %v361_v33 = vld [vmem:[%s1996_s27 + $0x378] sm:$0xff]  ;;  %p1713_p13 = pnand %p1712_p10, %p2413_p11 }
  0x65   : > { %v1329_v30 = vpack.c.bf16 %v362_v28, %v359_v27  ;;  %v358_v32 = vld [vmem:[%s1996_s27 + $0x360] sm:$0xff]  ;;  %v1267_v34 = vpack.c.bf16 %v265_v31, %v262_v29  ;;  %v269_v35 = vld [vmem:[%s1996_s27 + $0x98] sm:$0xff]  ;;  %v272_v36 = vld [vmem:[%s1996_s27 + $0xb0] sm:$0xff]  ;;  %p1720_p7 = por %p1719_p3, %p1718_p1 }
  0x66   : > { %1264 = vmatpush1.bf16.msra.mxu1 %v1263_v21  ;;  %v365_v37 = vld [vmem:[%s1996_s27 + $0x398] sm:$0xff]  ;;  %v1331_v38 = vpack.c.bf16 %v361_v33, %v358_v32  ;;  %v1269_v39 = vpack.c.bf16 %v272_v36, %v269_v35  ;;  %v368_v40 = vld [vmem:[%s1996_s27 + $0x3b0] sm:$0xff]  ;;  %v271_v42 = vld [vmem:[%s1996_s27 + $0xa8] sm:$0xff]  ;;  %p1714_p5 = pneg %p1713_p13 }
  0x67   : > { %1328 = vmatpush1.bf16.msra.mxu0 %v1327_v25  ;;  %1266 = vmatprep.subr.bf16.mxu1 %v1265_v26  ;;  %v268_v41 = vld [vmem:[%s1996_s27 + $0x90] sm:$0xff]  ;;  %v1333_v43 = vpack.c.bf16 %v368_v40, %v365_v37  ;;  %v367_v45 = vld [vmem:[%s1996_s27 + $0x3a8] sm:$0xff]  ;;  %v278_v47 = vld [vmem:[%s1996_s27 + $0xe0] sm:$0xff] }
  0x68   : > { %1330 = vmatprep.subr.bf16.mxu0 %v1329_v30  ;;  %v364_v44 = vld [vmem:[%s1996_s27 + $0x390] sm:$0xff]  ;;  %v275_v46 = vld [vmem:[%s1996_s27 + $0xc8] sm:$0xff]  ;;  %v374_v49 = vld [vmem:[%s1996_s27 + $0x3e0] sm:$0xff]  ;;  %v1271_v50 = vpack.c.bf16 %v271_v42, %v268_v41  ;;  %p1721_p8 = pnand %p1720_p7, %p1714_p5 }
  0x69   : > { %v371_v48 = vld [vmem:[%s1996_s27 + $0x3c8] sm:$0xff]  ;;  %v1335_v51 = vpack.c.bf16 %v367_v45, %v364_v44  ;;  %v1273_v52 = vpack.c.bf16 %v278_v47, %v275_v46  ;;  %v274_v53 = vld [vmem:[%s1996_s27 + $0xc0] sm:$0xff]  ;;  %v277_v54 = vld [vmem:[%s1996_s27 + $0xd8] sm:$0xff] }
  0x6a   : > { %1268 = vmatpush1.bf16.msra.mxu1 %v1267_v34  ;;  %v370_v55 = vld [vmem:[%s1996_s27 + $0x3c0] sm:$0xff]  ;;  %v1337_v56 = vpack.c.bf16 %v374_v49, %v371_v48  ;;  %v373_v57 = vld [vmem:[%s1996_s27 + $0x3d8] sm:$0xff]  ;;  %v284_v59 = vld [vmem:[%s1996_s27 + $0x110] sm:$0xff]  ;;  %v1275_v62 = vpack.c.bf16 %v277_v54, %v274_v53 }
  0x6b   : > { %1332 = vmatpush1.bf16.msra.mxu0 %v1331_v38  ;;  %1270 = vmatprep.subr.bf16.mxu1 %v1269_v39  ;;  %v281_v58 = vld [vmem:[%s1996_s27 + $0xf8] sm:$0xff]  ;;  %v380_v61 = vld [vmem:[%s1996_s27 + $0x410] sm:$0xff]  ;;  %v1339_v63 = vpack.c.bf16 %v373_v57, %v370_v55  ;;  %v283_v2 = vld [vmem:[%s1996_s27 + $0x108] sm:$0xff] }
  0x6c   : > { %1334 = vmatprep.subr.bf16.mxu0 %v1333_v43  ;;  %v377_v60 = vld [vmem:[%s1996_s27 + $0x3f8] sm:$0xff]  ;;  %v1277_v0 = vpack.c.bf16 %v284_v59, %v281_v58  ;;  %v280_v1 = vld [vmem:[%s1996_s27 + $0xf0] sm:$0xff]  ;;  %v379_v5 = vld [vmem:[%s1996_s27 + $0x408] sm:$0xff] }
  0x6d   : > { %v376_v3 = vld [vmem:[%s1996_s27 + $0x3f0] sm:$0xff]  ;;  %v1341_v4 = vpack.c.bf16 %v380_v61, %v377_v60  ;;  %v287_v6 = vld [vmem:[%s1996_s27 + $0x128] sm:$0xff]  ;;  %v290_v7 = vld [vmem:[%s1996_s27 + $0x140] sm:$0xff]  ;;  %v1279_v10 = vpack.c.bf16 %v283_v2, %v280_v1 }
  0x6e   : > { %1272 = vmatpush1.bf16.msra.mxu1 %v1271_v50  ;;  %v383_v8 = vld [vmem:[%s1996_s27 + $0x428] sm:$0xff]  ;;  %v386_v9 = vld [vmem:[%s1996_s27 + $0x440] sm:$0xff]  ;;  %v1343_v11 = vpack.c.bf16 %v379_v5, %v376_v3  ;;  %v1281_v12 = vpack.c.bf16 %v290_v7, %v287_v6  ;;  %v289_v14 = vld [vmem:[%s1996_s27 + $0x138] sm:$0xff] }
  0x6f   : > { %1336 = vmatpush1.bf16.msra.mxu0 %v1335_v51  ;;  %1274 = vmatprep.subr.bf16.mxu1 %v1273_v52  ;;  %v286_v13 = vld [vmem:[%s1996_s27 + $0x120] sm:$0xff]  ;;  %v1345_v16 = vpack.c.bf16 %v386_v9, %v383_v8  ;;  %v385_v17 = vld [vmem:[%s1996_s27 + $0x438] sm:$0xff]  ;;  %v296_v19 = vld [vmem:[%s1996_s27 + $0x170] sm:$0xff] }
  0x70   : > { %1338 = vmatprep.subr.bf16.mxu0 %v1337_v56  ;;  %v382_v15 = vld [vmem:[%s1996_s27 + $0x420] sm:$0xff]  ;;  %v293_v18 = vld [vmem:[%s1996_s27 + $0x158] sm:$0xff]  ;;  %v392_v21 = vld [vmem:[%s1996_s27 + $0x470] sm:$0xff]  ;;  %v1283_v22 = vpack.c.bf16 %v289_v14, %v286_v13 }
  0x71   : > { %v389_v20 = vld [vmem:[%s1996_s27 + $0x458] sm:$0xff]  ;;  %v1347_v23 = vpack.c.bf16 %v385_v17, %v382_v15  ;;  %v1285_v24 = vpack.c.bf16 %v296_v19, %v293_v18  ;;  %v292_v25 = vld [vmem:[%s1996_s27 + $0x150] sm:$0xff]  ;;  %v295_v26 = vld [vmem:[%s1996_s27 + $0x168] sm:$0xff] }
  0x72   : > { %1276 = vmatpush1.bf16.msra.mxu1 %v1275_v62  ;;  %v388_v27 = vld [vmem:[%s1996_s27 + $0x450] sm:$0xff]  ;;  %v1349_v28 = vpack.c.bf16 %v392_v21, %v389_v20  ;;  %v391_v29 = vld [vmem:[%s1996_s27 + $0x468] sm:$0xff]  ;;  %v302_v31 = vld [vmem:[%s1996_s27 + $0x1a0] sm:$0xff]  ;;  %v1287_v34 = vpack.c.bf16 %v295_v26, %v292_v25 }
  0x73   : > { %1340 = vmatpush1.bf16.msra.mxu0 %v1339_v63  ;;  %1278 = vmatprep.subr.bf16.mxu1 %v1277_v0  ;;  %v299_v30 = vld [vmem:[%s1996_s27 + $0x188] sm:$0xff]  ;;  %v398_v33 = vld [vmem:[%s1996_s27 + $0x4a0] sm:$0xff]  ;;  %v1351_v35 = vpack.c.bf16 %v391_v29, %v388_v27  ;;  %v301_v38 = vld [vmem:[%s1996_s27 + $0x198] sm:$0xff] }
  0x74   : > { %1342 = vmatprep.subr.bf16.mxu0 %v1341_v4  ;;  %v395_v32 = vld [vmem:[%s1996_s27 + $0x488] sm:$0xff]  ;;  %v1289_v36 = vpack.c.bf16 %v302_v31, %v299_v30  ;;  %v298_v37 = vld [vmem:[%s1996_s27 + $0x180] sm:$0xff]  ;;  %v397_v41 = vld [vmem:[%s1996_s27 + $0x498] sm:$0xff] }
  0x75   : > { %v394_v39 = vld [vmem:[%s1996_s27 + $0x480] sm:$0xff]  ;;  %v1353_v40 = vpack.c.bf16 %v398_v33, %v395_v32  ;;  %v305_v42 = vld [vmem:[%s1996_s27 + $0x1b8] sm:$0xff]  ;;  %v308_v43 = vld [vmem:[%s1996_s27 + $0x1d0] sm:$0xff]  ;;  %v1291_v46 = vpack.c.bf16 %v301_v38, %v298_v37 }
  0x76   : > { %1280 = vmatpush1.bf16.msra.mxu1 %v1279_v10  ;;  %v401_v44 = vld [vmem:[%s1996_s27 + $0x4b8] sm:$0xff]  ;;  %v404_v45 = vld [vmem:[%s1996_s27 + $0x4d0] sm:$0xff]  ;;  %v1355_v47 = vpack.c.bf16 %v397_v41, %v394_v39  ;;  %v1293_v48 = vpack.c.bf16 %v308_v43, %v305_v42  ;;  %v307_v50 = vld [vmem:[%s1996_s27 + $0x1c8] sm:$0xff] }
  0x77   : > { %1344 = vmatpush1.bf16.msra.mxu0 %v1343_v11  ;;  %1282 = vmatprep.subr.bf16.mxu1 %v1281_v12  ;;  %v304_v49 = vld [vmem:[%s1996_s27 + $0x1b0] sm:$0xff]  ;;  %v1357_v52 = vpack.c.bf16 %v404_v45, %v401_v44  ;;  %v403_v53 = vld [vmem:[%s1996_s27 + $0x4c8] sm:$0xff]  ;;  %v314_v55 = vld [vmem:[%s1996_s27 + $0x200] sm:$0xff] }
  0x78   : > { %1346 = vmatprep.subr.bf16.mxu0 %v1345_v16  ;;  %v400_v51 = vld [vmem:[%s1996_s27 + $0x4b0] sm:$0xff]  ;;  %v311_v54 = vld [vmem:[%s1996_s27 + $0x1e8] sm:$0xff]  ;;  %v410_v57 = vld [vmem:[%s1996_s27 + $0x500] sm:$0xff]  ;;  %v1295_v58 = vpack.c.bf16 %v307_v50, %v304_v49 }
  0x79   : > { %v407_v56 = vld [vmem:[%s1996_s27 + $0x4e8] sm:$0xff]  ;;  %v1359_v59 = vpack.c.bf16 %v403_v53, %v400_v51  ;;  %v1297_v60 = vpack.c.bf16 %v314_v55, %v311_v54  ;;  %v310_v61 = vld [vmem:[%s1996_s27 + $0x1e0] sm:$0xff]  ;;  %v313_v62 = vld [vmem:[%s1996_s27 + $0x1f8] sm:$0xff] }
  0x7a   : > { %1284 = vmatpush1.bf16.msra.mxu1 %v1283_v22  ;;  %v406_v63 = vld [vmem:[%s1996_s27 + $0x4e0] sm:$0xff]  ;;  %v1361_v0 = vpack.c.bf16 %v410_v57, %v407_v56  ;;  %v409_v1 = vld [vmem:[%s1996_s27 + $0x4f8] sm:$0xff]  ;;  %v320_v3 = vld [vmem:[%s1996_s27 + $0x230] sm:$0xff]  ;;  %v1299_v6 = vpack.c.bf16 %v313_v62, %v310_v61 }
  0x7b   : > { %1348 = vmatpush1.bf16.msra.mxu0 %v1347_v23  ;;  %1286 = vmatprep.subr.bf16.mxu1 %v1285_v24  ;;  %v317_v2 = vld [vmem:[%s1996_s27 + $0x218] sm:$0xff]  ;;  %v416_v5 = vld [vmem:[%s1996_s27 + $0x530] sm:$0xff]  ;;  %v1363_v8 = vpack.c.bf16 %v409_v1, %v406_v63  ;;  %v319_v10 = vld [vmem:[%s1996_s27 + $0x228] sm:$0xff] }
  0x7c   : > { %1350 = vmatprep.subr.bf16.mxu0 %v1349_v28  ;;  %v413_v4 = vld [vmem:[%s1996_s27 + $0x518] sm:$0xff]  ;;  %v316_v7 = vld [vmem:[%s1996_s27 + $0x210] sm:$0xff]  ;;  %v1301_v9 = vpack.c.bf16 %v320_v3, %v317_v2  ;;  %v415_v12 = vld [vmem:[%s1996_s27 + $0x528] sm:$0xff] }
  0x7d   : > { %v412_v11 = vld [vmem:[%s1996_s27 + $0x510] sm:$0xff]  ;;  %v1365_v13 = vpack.c.bf16 %v416_v5, %v413_v4  ;;  %v323_v14 = vld [vmem:[%s1996_s27 + $0x248] sm:$0xff]  ;;  %v326_v15 = vld [vmem:[%s1996_s27 + $0x260] sm:$0xff]  ;;  %v1303_v20 = vpack.c.bf16 %v319_v10, %v316_v7 }
  0x7e   : > { %1288 = vmatpush1.bf16.msra.mxu1 %v1287_v34  ;;  %v2100_v16 = vld [vmem:[#allocation2 + $0x8] sm:$0xff]  ;;  %v422_v18 = vld [vmem:[%s1996_s27 + $0x560] sm:$0xff]  ;;  %v2105_v19 = vld [vmem:[#allocation2 + $0x18] sm:$0xff]  ;;  %v1367_v21 = vpack.c.bf16 %v415_v12, %v412_v11  ;;  %v1305_v22 = vpack.c.bf16 %v326_v15, %v323_v14 }
  0x7f   : > { %1352 = vmatpush1.bf16.msra.mxu0 %v1351_v35  ;;  %1290 = vmatprep.subr.bf16.mxu1 %v1289_v36  ;;  %v419_v17 = vld [vmem:[%s1996_s27 + $0x548] sm:$0xff]  ;;  %v322_v23 = vld [vmem:[%s1996_s27 + $0x240] sm:$0xff]  ;;  %v325_v24 = vld [vmem:[%s1996_s27 + $0x258] sm:$0xff] }
  0x80   : > { %1354 = vmatprep.subr.bf16.mxu0 %v1353_v40  ;;  %602 = vmatprep.mubr.f32.mxu1 %v2100_v16  ;;  %v418_v25 = vld [vmem:[%s1996_s27 + $0x540] sm:$0xff]  ;;  %v1369_v26 = vpack.c.bf16 %v422_v18, %v419_v17  ;;  %v421_v27 = vld [vmem:[%s1996_s27 + $0x558] sm:$0xff]  ;;  %v332_v29 = vld [vmem:[%s1996_s27 + $0x290] sm:$0xff]  ;;  %v1307_v32 = vpack.c.bf16 %v325_v24, %v322_v23 }
  0x81   : > { %679 = vmatprep.mubr.f32.mxu0 %v2105_v19  ;;  %v329_v28 = vld [vmem:[%s1996_s27 + $0x278] sm:$0xff]  ;;  %v428_v31 = vld [vmem:[%s1996_s27 + $0x590] sm:$0xff]  ;;  %v1371_v33 = vpack.c.bf16 %v421_v27, %v418_v25  ;;  %v331_v36 = vld [vmem:[%s1996_s27 + $0x288] sm:$0xff] }
  0x82   : > { %1292 = vmatpush1.bf16.msra.mxu1 %v1291_v46  ;;  %v425_v30 = vld [vmem:[%s1996_s27 + $0x578] sm:$0xff]  ;;  %v1309_v34 = vpack.c.bf16 %v332_v29, %v329_v28  ;;  %v328_v35 = vld [vmem:[%s1996_s27 + $0x270] sm:$0xff]  ;;  %v427_v39 = vld [vmem:[%s1996_s27 + $0x588] sm:$0xff] }
  0x83   : > { %1356 = vmatpush1.bf16.msra.mxu0 %v1355_v47  ;;  %1294 = vmatprep.subr.bf16.mxu1 %v1293_v48  ;;  %v424_v37 = vld [vmem:[%s1996_s27 + $0x570] sm:$0xff]  ;;  %v1373_v38 = vpack.c.bf16 %v428_v31, %v425_v30  ;;  %v335_v40 = vld [vmem:[%s1996_s27 + $0x2a8] sm:$0xff]  ;;  %v338_v41 = vld [vmem:[%s1996_s27 + $0x2c0] sm:$0xff]  ;;  %v1311_v44 = vpack.c.bf16 %v331_v36, %v328_v35 }
  0x84   : > { %1358 = vmatprep.subr.bf16.mxu0 %v1357_v52  ;;  %v431_v42 = vld [vmem:[%s1996_s27 + $0x5a8] sm:$0xff]  ;;  %v434_v43 = vld [vmem:[%s1996_s27 + $0x5c0] sm:$0xff]  ;;  %v1375_v45 = vpack.c.bf16 %v427_v39, %v424_v37  ;;  %v1313_v46 = vpack.c.bf16 %v338_v41, %v335_v40  ;;  %v337_v48 = vld [vmem:[%s1996_s27 + $0x2b8] sm:$0xff] }
  0x85   : > { %v334_v47 = vld [vmem:[%s1996_s27 + $0x2a0] sm:$0xff]  ;;  %v1377_v50 = vpack.c.bf16 %v434_v43, %v431_v42  ;;  %v433_v51 = vld [vmem:[%s1996_s27 + $0x5b8] sm:$0xff]  ;;  %v344_v53 = vld [vmem:[%s1996_s27 + $0x2f0] sm:$0xff] }
  0x86   : > { %1296 = vmatpush1.bf16.msra.mxu1 %v1295_v58  ;;  %v430_v49 = vld [vmem:[%s1996_s27 + $0x5a0] sm:$0xff]  ;;  %v341_v52 = vld [vmem:[%s1996_s27 + $0x2d8] sm:$0xff]  ;;  %v440_v55 = vld [vmem:[%s1996_s27 + $0x5f0] sm:$0xff]  ;;  %v1315_v56 = vpack.c.bf16 %v337_v48, %v334_v47 }
  0x87   : > { %1360 = vmatpush1.bf16.msra.mxu0 %v1359_v59  ;;  %1298 = vmatprep.subr.bf16.mxu1 %v1297_v60  ;;  %v437_v54 = vld [vmem:[%s1996_s27 + $0x5d8] sm:$0xff]  ;;  %v1379_v57 = vpack.c.bf16 %v433_v51, %v430_v49  ;;  %v1317_v58 = vpack.c.bf16 %v344_v53, %v341_v52  ;;  %v340_v59 = vld [vmem:[%s1996_s27 + $0x2d0] sm:$0xff]  ;;  %v343_v60 = vld [vmem:[%s1996_s27 + $0x2e8] sm:$0xff] }
  0x88   : > { %1362 = vmatprep.subr.bf16.mxu0 %v1361_v0  ;;  %v436_v61 = vld [vmem:[%s1996_s27 + $0x5d0] sm:$0xff]  ;;  %v1381_v62 = vpack.c.bf16 %v440_v55, %v437_v54  ;;  %v439_v63 = vld [vmem:[%s1996_s27 + $0x5e8] sm:$0xff]  ;;  %v446_v3 = vld [vmem:[%s1996_s27 + $0x620] sm:$0xff]  ;;  %v1319_v4 = vpack.c.bf16 %v343_v60, %v340_v59 }
  0x89   : > { %v300_v0 = vld [vmem:[%s1996_s27 + $0x190] sm:$0xff]  ;;  %v303_v1 = vld [vmem:[%s1996_s27 + $0x1a8] sm:$0xff]  ;;  %v1383_v5 = vpack.c.bf16 %v439_v63, %v436_v61  ;;  %v442_v7 = vld [vmem:[%s1996_s27 + $0x600] sm:$0xff] }
  0x8a   : > { %1300 = vmatpush1.bf16.msra.mxu1 %v1299_v6  ;;  %v443_v2 = vld [vmem:[%s1996_s27 + $0x608] sm:$0xff]  ;;  %v1449_v6 = vpack.c.bf16 %v303_v1, %v300_v0  ;;  %v445_v11 = vld [vmem:[%s1996_s27 + $0x618] sm:$0xff]  ;;  %v306_v12 = vld [vmem:[%s1996_s27 + $0x1c0] sm:$0xff] }
  0x8b   : > { %1364 = vmatpush1.bf16.msra.mxu0 %v1363_v8  ;;  %1302 = vmatprep.subr.bf16.mxu1 %v1301_v9  ;;  %v252_v8 = vld [vmem:[%s1996_s27 + $0x10] sm:$0xff]  ;;  %v255_v9 = vld [vmem:[%s1996_s27 + $0x28] sm:$0xff]  ;;  %v1385_v10 = vpack.c.bf16 %v446_v3, %v443_v2  ;;  %v449_v14 = vld [vmem:[%s1996_s27 + $0x638] sm:$0xff] }
  0x8c   : > { %1366 = vmatprep.subr.bf16.mxu0 %v1365_v13  ;;  %v309_v13 = vld [vmem:[%s1996_s27 + $0x1d8] sm:$0xff]  ;;  %v452_v15 = vld [vmem:[%s1996_s27 + $0x650] sm:$0xff]  ;;  %v2148_v17 = vld [vmem:[#allocation2] sm:$0xff] }
  0x8d   : > { %v2150_v18 = vld [vmem:[#allocation2 + $0x10] sm:$0xff]  ;;  %v258_v24 = vld [vmem:[%s1996_s27 + $0x40] sm:$0xff]  ;;  %v261_v25 = vld [vmem:[%s1996_s27 + $0x58] sm:$0xff] }
  0x8e   : > { %1304 = vmatpush1.bf16.msra.mxu1 %v1303_v20  ;;  %v1451_v20 = vpack.c.bf16 %v255_v9, %v252_v8  ;;  %v448_v23 = vld [vmem:[%s1996_s27 + $0x630] sm:$0xff]  ;;  %v451_v27 = vld [vmem:[%s1996_s27 + $0x648] sm:$0xff]  ;;  %v458_v31 = vld [vmem:[%s1996_s27 + $0x680] sm:$0xff] }
  0x8f   : > { %1368 = vmatpush1.bf16.msra.mxu0 %v1367_v21  ;;  %1306 = vmatprep.subr.bf16.mxu1 %v1305_v22  ;;  %v1387_v21 = vpack.c.bf16 %v445_v11, %v442_v7  ;;  %v1453_v22 = vpack.c.bf16 %v309_v13, %v306_v12  ;;  %v312_v28 = vld [vmem:[%s1996_s27 + $0x1f0] sm:$0xff]  ;;  %v315_v29 = vld [vmem:[%s1996_s27 + $0x208] sm:$0xff]  ;;  %v1391_v35 = vpack.c.bf16 %v451_v27, %v448_v23  ;;  %v454_v37 = vld [vmem:[%s1996_s27 + $0x660] sm:$0xff] }
  0x90   : > { %1370 = vmatprep.subr.bf16.mxu0 %v1369_v26  ;;  %v1389_v26 = vpack.c.bf16 %v452_v15, %v449_v14  ;;  %v455_v30 = vld [vmem:[%s1996_s27 + $0x668] sm:$0xff]  ;;  %v1457_v36 = vpack.c.bf16 %v315_v29, %v312_v28  ;;  %v457_v41 = vld [vmem:[%s1996_s27 + $0x678] sm:$0xff]  ;;  %v318_v42 = vld [vmem:[%s1996_s27 + $0x220] sm:$0xff] }
  0x91   : > { %v267_v39 = vld [vmem:[%s1996_s27 + $0x88] sm:$0xff]  ;;  %v1393_v40 = vpack.c.bf16 %v458_v31, %v455_v30  ;;  %v321_v43 = vld [vmem:[%s1996_s27 + $0x238] sm:$0xff]  ;;  %v1395_v47 = vpack.c.bf16 %v457_v41, %v454_v37  ;;  %v460_v49 = vld [vmem:[%s1996_s27 + $0x690] sm:$0xff] }
  0x92   : > { %1308 = vmatpush1.bf16.msra.mxu1 %v1307_v32  ;;  %v2161_v32 = vld [vmem:[#allocation2 + $0x38] sm:$0xff]  ;;  %v1461_v48 = vpack.c.bf16 %v321_v43, %v318_v42  ;;  %v463_v53 = vld [vmem:[%s1996_s27 + $0x6a8] sm:$0xff]  ;;  %v324_v54 = vld [vmem:[%s1996_s27 + $0x250] sm:$0xff] }
  0x93   : > { %1372 = vmatpush1.bf16.msra.mxu0 %v1371_v33  ;;  %1310 = vmatprep.subr.bf16.mxu1 %v1309_v34  ;;  %v1455_v33 = vpack.c.bf16 %v261_v25, %v258_v24  ;;  %v2164_v34 = vld [vmem:[#allocation2 + $0x30] sm:$0xff]  ;;  %v273_v51 = vld [vmem:[%s1996_s27 + $0xb8] sm:$0xff]  ;;  %v327_v55 = vld [vmem:[%s1996_s27 + $0x268] sm:$0xff] }
  0x94   : > { %1374 = vmatprep.subr.bf16.mxu0 %v1373_v38  ;;  %v264_v38 = vld [vmem:[%s1996_s27 + $0x70] sm:$0xff]  ;;  %v1465_v59 = vpack.c.bf16 %v327_v55, %v324_v54  ;;  %v466_v60 = vld [vmem:[%s1996_s27 + $0x6c0] sm:$0xff]  ;;  %v469_v0 = vld [vmem:[%s1996_s27 + $0x6d8] sm:$0xff] }
  0x95   : > { %v276_v61 = vld [vmem:[%s1996_s27 + $0xd0] sm:$0xff]  ;;  %v330_v1 = vld [vmem:[%s1996_s27 + $0x280] sm:$0xff]  ;;  %v333_v2 = vld [vmem:[%s1996_s27 + $0x298] sm:$0xff] }
  0x96   : > { %1312 = vmatpush1.bf16.msra.mxu1 %v1311_v44  ;;  %v461_v44 = vld [vmem:[%s1996_s27 + $0x698] sm:$0xff]  ;;  %v1469_v7 = vpack.c.bf16 %v333_v2, %v330_v1  ;;  %v472_v8 = vld [vmem:[%s1996_s27 + $0x6f0] sm:$0xff]  ;;  %v282_v9 = vld [vmem:[%s1996_s27 + $0x100] sm:$0xff] }
  0x97   : > { %1376 = vmatpush1.bf16.msra.mxu0 %v1375_v45  ;;  %1314 = vmatprep.subr.bf16.mxu1 %v1313_v46  ;;  %v464_v45 = vld [vmem:[%s1996_s27 + $0x6b0] sm:$0xff]  ;;  %v1459_v46 = vpack.c.bf16 %v267_v39, %v264_v38  ;;  %v473_v3 = vld [vmem:[%s1996_s27 + $0x6f8] sm:$0xff]  ;;  %v475_v12 = vld [vmem:[%s1996_s27 + $0x708] sm:$0xff] }
  0x98   : > { %1378 = vmatprep.subr.bf16.mxu0 %v1377_v50  ;;  %v270_v50 = vld [vmem:[%s1996_s27 + $0xa0] sm:$0xff]  ;;  %v1397_v52 = vpack.c.bf16 %v464_v45, %v461_v44  ;;  %v336_v13 = vld [vmem:[%s1996_s27 + $0x2b0] sm:$0xff]  ;;  %v339_v14 = vld [vmem:[%s1996_s27 + $0x2c8] sm:$0xff]  ;;  %v1407_v24 = vpack.c.bf16 %v475_v12, %v472_v8 }
  0x99   : > { %v479_v15 = vld [vmem:[%s1996_s27 + $0x728] sm:$0xff]  ;;  %v1473_v25 = vpack.c.bf16 %v339_v14, %v336_v13  ;;  %v2206_v28 = vld [vmem:[#allocation2 + $0x40] sm:$0xff]  ;;  %v481_v30 = vld [vmem:[%s1996_s27 + $0x738] sm:$0xff] }
  0x9a   : > { %1316 = vmatpush1.bf16.msra.mxu1 %v1315_v56  ;;  %v467_v56 = vld [vmem:[%s1996_s27 + $0x6c8] sm:$0xff]  ;;  %v342_v31 = vld [vmem:[%s1996_s27 + $0x2e0] sm:$0xff]  ;;  %v484_v41 = vld [vmem:[%s1996_s27 + $0x750] sm:$0xff] }
  0x9b   : > { %1380 = vmatpush1.bf16.msra.mxu0 %v1379_v57  ;;  %1318 = vmatprep.subr.bf16.mxu1 %v1317_v58  ;;  %v1463_v57 = vpack.c.bf16 %v273_v51, %v270_v50  ;;  %v1399_v58 = vpack.c.bf16 %v463_v53, %v460_v49  ;;  %v2202_v23 = vld [vmem:[#allocation2 + $0x48] sm:$0xff]  ;;  %v294_v42 = vld [vmem:[%s1996_s27 + $0x160] sm:$0xff]  ;;  %v297_v43 = vld [vmem:[%s1996_s27 + $0x178] sm:$0xff] }
  0x9c   : > { %1382 = vmatprep.subr.bf16.mxu0 %v1381_v62  ;;  %v279_v62 = vld [vmem:[%s1996_s27 + $0xe8] sm:$0xff]  ;;  %v494_v49 = vld [vmem:[%s1996_s27 + $0x7a0] sm:$0xff]  ;;  %v1479_v50 = vpack.c.bf16 %v297_v43, %v294_v42  ;;  %v348_v54 = vld [vmem:[%s1996_s27 + $0x310] sm:$0xff] }
  0x9d   : > { %v291_v27 = vld [vmem:[%s1996_s27 + $0x148] sm:$0xff]  ;;  %v490_v53 = vld [vmem:[%s1996_s27 + $0x780] sm:$0xff]  ;;  %v357_v2 = vld [vmem:[%s1996_s27 + $0x358] sm:$0xff] }
  0x9e   : > { %1320 = vmatpush1.bf16.msra.mxu1 %v1319_v4  ;;  %v476_v4 = vld [vmem:[%s1996_s27 + $0x710] sm:$0xff]  ;;  %v2215_v38 = vld [vmem:[#allocation2 + $0x28] sm:$0xff]  ;;  %v354_v1 = vld [vmem:[%s1996_s27 + $0x340] sm:$0xff] }
  0x9f   : > { %1384 = vmatpush1.bf16.msra.mxu0 %v1383_v5  ;;  %1450 = vmatprep.subr.bf16.mxu1 %v1449_v6  ;;  %v1467_v5 = vpack.c.bf16 %v279_v62, %v276_v61  ;;  %v1403_v6 = vpack.c.bf16 %v469_v0, %v466_v60  ;;  %v1405_v11 = vpack.c.bf16 %v476_v4, %v473_v3  ;;  %v487_v45 = vld [vmem:[%s1996_s27 + $0x768] sm:$0xff]  ;;  %v500_v60 = vld [vmem:[%s1996_s27 + $0x7d0] sm:$0xff]  ;;  %v506_v8 = vld [vmem:[%s1996_s27 + $0x800] sm:$0xff] }
  0xa0   : > { %1386 = vmatprep.subr.bf16.mxu0 %v1385_v10  ;;  %v285_v10 = vld [vmem:[%s1996_s27 + $0x118] sm:$0xff]  ;;  %v1415_v51 = vpack.c.bf16 %v487_v45, %v484_v41  ;;  %v351_v55 = vld [vmem:[%s1996_s27 + $0x328] sm:$0xff]  ;;  %v496_v0 = vld [vmem:[%s1996_s27 + $0x7b0] sm:$0xff] }
  0xa1   : > { %603 = vmatmul.mubr.f32.vlgmr.msra.gmra.mrb[0].mxu1 %v2148_v17  ;;  %v1483_v61 = vpack.c.bf16 %v351_v55, %v348_v54  ;;  %v499_v4 = vld [vmem:[%s1996_s27 + $0x7c8] sm:$0xff]  ;;  %v502_v12 = vld [vmem:[%s1996_s27 + $0x7e0] sm:$0xff]  ;;  %v360_v13 = vld [vmem:[%s1996_s27 + $0x370] sm:$0xff] }
  0xa2   : > { %680 = vmatmul.mubr.f32.vlgmr.msra.gmra.mrb[0].mxu0 %v2150_v18  ;;  %1452 = vmatpush3.bf16.msra.mxu1 %v1451_v20  ;;  %v482_v20 = vld [vmem:[%s1996_s27 + $0x740] sm:$0xff]  ;;  %v363_v14 = vld [vmem:[%s1996_s27 + $0x388] sm:$0xff]  ;;  %v372_v42 = vld [vmem:[%s1996_s27 + $0x3d0] sm:$0xff] }
  0xa3   : > { %1388 = vmatpush1.bf16.msra.mxu0 %v1387_v21  ;;  %1454 = vmatprep.subr.bf16.mxu1 %v1453_v22  ;;  %v1471_v21 = vpack.c.bf16 %v285_v10, %v282_v9  ;;  %v478_v22 = vld [vmem:[%s1996_s27 + $0x720] sm:$0xff]  ;;  %v1409_v29 = vpack.c.bf16 %v482_v20, %v479_v15  ;;  %v1487_v9 = vpack.c.bf16 %v357_v2, %v354_v1  ;;  %v505_v15 = vld [vmem:[%s1996_s27 + $0x7f8] sm:$0xff]  ;;  %v375_v43 = vld [vmem:[%s1996_s27 + $0x3e8] sm:$0xff] }
  0xa4   : > { %1390 = vmatprep.subr.bf16.mxu0 %v1389_v26  ;;  %608 = vmatprep.mubr.f32.mxu1 %v2161_v32  ;;  %v288_v26 = vld [vmem:[%s1996_s27 + $0x130] sm:$0xff]  ;;  %v1411_v39 = vpack.c.bf16 %v481_v30, %v478_v22  ;;  %v1423_v10 = vpack.c.bf16 %v499_v4, %v496_v0  ;;  %v414_v20 = vld [vmem:[%s1996_s27 + $0x520] sm:$0xff]  ;;  %v509_v22 = vld [vmem:[%s1996_s27 + $0x818] sm:$0xff] }
  0xa5   : > { %609 = vmatmul.mubr.f32.gmra.mrb[2].mxu1 %v2164_v34  ;;  %685 = vmatprep.mubr.f32.mxu0 %v2202_v23  ;;  %v1475_v37 = vpack.c.bf16 %v291_v27, %v288_v26  ;;  %v508_v27 = vld [vmem:[%s1996_s27 + $0x810] sm:$0xff]  ;;  %v369_v30 = vld [vmem:[%s1996_s27 + $0x3b8] sm:$0xff]  ;;  %v514_v41 = vld [vmem:[%s1996_s27 + $0x840] sm:$0xff] }
  0xa6   : > { %1456 = vmatpush3.bf16.msra.mxu1 %v1455_v33  ;;  %833 = vmatprep.mubr.f32.mxu1 %v2100_v16  ;;  %v470_v16 = vld [vmem:[%s1996_s27 + $0x6e0] sm:$0xff]  ;;  %v345_v33 = vld [vmem:[%s1996_s27 + $0x2f8] sm:$0xff]  ;;  %v384_v1 = vld [vmem:[%s1996_s27 + $0x430] sm:$0xff] }
  0xa7   : > { %1392 = vmatpush1.bf16.msra.mxu0 %v1391_v35  ;;  %1458 = vmatprep.subr.bf16.mxu1 %v1457_v36  ;;  %v1401_v63 = vpack.c.bf16 %v470_v16, %v467_v56  ;;  %v485_v35 = vld [vmem:[%s1996_s27 + $0x758] sm:$0xff]  ;;  %v488_v36 = vld [vmem:[%s1996_s27 + $0x770] sm:$0xff]  ;;  %v378_v54 = vld [vmem:[%s1996_s27 + $0x400] sm:$0xff] }
  0xa8   : > { %1394 = vmatprep.subr.bf16.mxu0 %v1393_v40  ;;  %686 = vmatmul.mubr.f32.gmra.mrb[2].mxu0 %v2206_v28  ;;  %v1477_v40 = vpack.c.bf16 %v345_v33, %v342_v31  ;;  %v1413_v44 = vpack.c.bf16 %v488_v36, %v485_v35  ;;  %v493_v16 = vld [vmem:[%s1996_s27 + $0x798] sm:$0xff]  ;;  %v511_v33 = vld [vmem:[%s1996_s27 + $0x828] sm:$0xff]  ;;  %v526_v0 = vld [vmem:[%s1996_s27 + $0x8a0] sm:$0xff] }
  0xa9   : > { %756 = vmatprep.mubr.f32.mxu0 %v2215_v38  ;;  %v1419_v62 = vpack.c.bf16 %v493_v16, %v490_v53  ;;  %v423_v35 = vld [vmem:[%s1996_s27 + $0x568] sm:$0xff]  ;;  %v517_v45 = vld [vmem:[%s1996_s27 + $0x858] sm:$0xff]  ;;  %v520_v53 = vld [vmem:[%s1996_s27 + $0x870] sm:$0xff] }
  0xaa   : > { %1460 = vmatpush3.bf16.msra.mxu1 %v1459_v46  ;;  %v396_v46 = vld [vmem:[%s1996_s27 + $0x490] sm:$0xff]  ;;  %v515_v36 = vld [vmem:[%s1996_s27 + $0x848] sm:$0xff]  ;;  %v381_v55 = vld [vmem:[%s1996_s27 + $0x418] sm:$0xff] }
  0xab   : > { %1396 = vmatpush1.bf16.msra.mxu0 %v1395_v47  ;;  %1462 = vmatprep.subr.bf16.mxu1 %v1461_v48  ;;  %v399_v47 = vld [vmem:[%s1996_s27 + $0x4a8] sm:$0xff]  ;;  %v529_v4 = vld [vmem:[%s1996_s27 + $0x8b8] sm:$0xff] }
  0xac   : > { %1398 = vmatprep.subr.bf16.mxu0 %v1397_v52  ;;  %v491_v48 = vld [vmem:[%s1996_s27 + $0x788] sm:$0xff]  ;;  %v1481_v52 = vpack.c.bf16 %v399_v47, %v396_v46  ;;  %v426_v46 = vld [vmem:[%s1996_s27 + $0x580] sm:$0xff]  ;;  %v429_v47 = vld [vmem:[%s1996_s27 + $0x598] sm:$0xff] }
  0xad   : > { %v1417_v56 = vpack.c.bf16 %v494_v49, %v491_v48  ;;  %v521_v48 = vld [vmem:[%s1996_s27 + $0x878] sm:$0xff]  ;;  %v524_v49 = vld [vmem:[%s1996_s27 + $0x890] sm:$0xff]  ;;  %v523_v16 = vld [vmem:[%s1996_s27 + $0x888] sm:$0xff] }
  0xae   : > { %1464 = vmatpush3.bf16.msra.mxu1 %v1463_v57  ;;  %v402_v57 = vld [vmem:[%s1996_s27 + $0x4c0] sm:$0xff]  ;;  %v387_v2 = vld [vmem:[%s1996_s27 + $0x448] sm:$0xff] }
  0xaf   : > { %1400 = vmatpush1.bf16.msra.mxu0 %v1399_v58  ;;  %1466 = vmatprep.subr.bf16.mxu1 %v1465_v59  ;;  %v405_v58 = vld [vmem:[%s1996_s27 + $0x4d8] sm:$0xff] }
  0xb0   : > { %1402 = vmatprep.subr.bf16.mxu0 %v1401_v63  ;;  %v497_v59 = vld [vmem:[%s1996_s27 + $0x7b8] sm:$0xff]  ;;  %v1485_v63 = vpack.c.bf16 %v405_v58, %v402_v57  ;;  %v432_v57 = vld [vmem:[%s1996_s27 + $0x5b0] sm:$0xff]  ;;  %v435_v58 = vld [vmem:[%s1996_s27 + $0x5c8] sm:$0xff] }
  0xb1   : > { %v1421_v3 = vpack.c.bf16 %v500_v60, %v497_v59  ;;  %v527_v59 = vld [vmem:[%s1996_s27 + $0x8a8] sm:$0xff]  ;;  %v530_v60 = vld [vmem:[%s1996_s27 + $0x8c0] sm:$0xff] }
  0xb2   : > { %1468 = vmatpush3.bf16.msra.mxu1 %v1467_v5  ;;  %v408_v5 = vld [vmem:[%s1996_s27 + $0x4f0] sm:$0xff] }
  0xb3   : > { %1404 = vmatpush1.bf16.msra.mxu0 %v1403_v6  ;;  %1470 = vmatprep.subr.bf16.mxu1 %v1469_v7  ;;  %v411_v6 = vld [vmem:[%s1996_s27 + $0x508] sm:$0xff] }
  0xb4   : > { %1406 = vmatprep.subr.bf16.mxu0 %v1405_v11  ;;  %v503_v7 = vld [vmem:[%s1996_s27 + $0x7e8] sm:$0xff]  ;;  %v1489_v11 = vpack.c.bf16 %v411_v6, %v408_v5  ;;  %v438_v5 = vld [vmem:[%s1996_s27 + $0x5e0] sm:$0xff]  ;;  %v441_v6 = vld [vmem:[%s1996_s27 + $0x5f8] sm:$0xff] }
  0xb6   : > { %1472 = vmatpush3.bf16.msra.mxu1 %v1471_v21  ;;  %v417_v21 = vld [vmem:[%s1996_s27 + $0x538] sm:$0xff] }
  0xb7   : > { %1408 = vmatpush1.bf16.msra.mxu0 %v1407_v24  ;;  %1474 = vmatprep.subr.bf16.mxu1 %v1473_v25  ;;  %v512_v24 = vld [vmem:[%s1996_s27 + $0x830] sm:$0xff]  ;;  %v1427_v25 = vpack.c.bf16 %v505_v15, %v502_v12  ;;  %v1493_v26 = vpack.c.bf16 %v417_v21, %v414_v20  ;;  %v535_v15 = vld [vmem:[%s1996_s27 + $0x8e8] sm:$0xff] }
  0xb8   : > { %1410 = vmatprep.subr.bf16.mxu0 %v1409_v29  ;;  %v366_v29 = vld [vmem:[%s1996_s27 + $0x3a0] sm:$0xff]  ;;  %v1429_v31 = vpack.c.bf16 %v512_v24, %v509_v22  ;;  %v532_v12 = vld [vmem:[%s1996_s27 + $0x8d0] sm:$0xff]  ;;  %v495_v21 = vld [vmem:[%s1996_s27 + $0x7a8] sm:$0xff] }
  0xb9   : > { %v492_v20 = vld [vmem:[%s1996_s27 + $0x790] sm:$0xff]  ;;  %v1447_v24 = vpack.c.bf16 %v535_v15, %v532_v12 }
  0xba   : > { %1476 = vmatpush3.bf16.msra.mxu1 %v1475_v37  ;;  %v1495_v37 = vpack.c.bf16 %v369_v30, %v366_v29  ;;  %v501_v29 = vld [vmem:[%s1996_s27 + $0x7d8] sm:$0xff] }
  0xbb   : > { %1412 = vmatpush1.bf16.msra.mxu0 %v1411_v39  ;;  %1478 = vmatprep.subr.bf16.mxu1 %v1477_v40  ;;  %v1431_v39 = vpack.c.bf16 %v511_v33, %v508_v27  ;;  %v498_v27 = vld [vmem:[%s1996_s27 + $0x7c0] sm:$0xff] }
  0xbc   : > { %1414 = vmatprep.subr.bf16.mxu0 %v1413_v44  ;;  %v450_v33 = vld [vmem:[%s1996_s27 + $0x640] sm:$0xff] }
  0xbe   : > { %1480 = vmatpush3.bf16.msra.mxu1 %v1479_v50  ;;  %v1499_v50 = vpack.c.bf16 %v375_v43, %v372_v42  ;;  %v456_v42 = vld [vmem:[%s1996_s27 + $0x670] sm:$0xff]  ;;  %v459_v43 = vld [vmem:[%s1996_s27 + $0x688] sm:$0xff] }
  0xbf   : > { %1416 = vmatpush1.bf16.msra.mxu0 %v1415_v51  ;;  %1482 = vmatprep.subr.bf16.mxu1 %v1481_v52  ;;  %v1435_v51 = vpack.c.bf16 %v517_v45, %v514_v41  ;;  %v1501_v52 = vpack.c.bf16 %v429_v47, %v426_v46  ;;  %v1523_v45 = vpack.c.bf16 %v459_v43, %v456_v42  ;;  %v462_v47 = vld [vmem:[%s1996_s27 + $0x6a0] sm:$0xff] }
  0xc0   : > { %1418 = vmatprep.subr.bf16.mxu0 %v1417_v56  ;;  %v1437_v56 = vpack.c.bf16 %v524_v49, %v521_v48  ;;  %v516_v48 = vld [vmem:[%s1996_s27 + $0x850] sm:$0xff]  ;;  %v519_v49 = vld [vmem:[%s1996_s27 + $0x868] sm:$0xff] }
  0xc1   : > { %834 = vmatmul.mubr.f32.vlgmr.msra.gmra.mrb[4].mxu1 %v2148_v17  ;;  %v1425_v17 = vpack.c.bf16 %v506_v8, %v503_v7  ;;  %v533_v7 = vld [vmem:[%s1996_s27 + $0x8d8] sm:$0xff]  ;;  %v536_v8 = vld [vmem:[%s1996_s27 + $0x8f0] sm:$0xff] }
  0xc2   : > { %1484 = vmatpush3.bf16.msra.mxu1 %v1483_v61  ;;  %838 = vmatprep.mubr.f32.mxu1 %v2161_v32  ;;  %v1491_v32 = vpack.c.bf16 %v363_v14, %v360_v13  ;;  %v1503_v61 = vpack.c.bf16 %v381_v55, %v378_v54  ;;  %v390_v13 = vld [vmem:[%s1996_s27 + $0x460] sm:$0xff]  ;;  %v393_v14 = vld [vmem:[%s1996_s27 + $0x478] sm:$0xff] }
  0xc3   : > { %1420 = vmatpush1.bf16.msra.mxu0 %v1419_v62  ;;  %1486 = vmatprep.subr.bf16.mxu1 %v1485_v63  ;;  %v1439_v62 = vpack.c.bf16 %v523_v16, %v520_v53  ;;  %v1505_v63 = vpack.c.bf16 %v435_v58, %v432_v57  ;;  %v1511_v22 = vpack.c.bf16 %v393_v14, %v390_v13  ;;  %v522_v53 = vld [vmem:[%s1996_s27 + $0x880] sm:$0xff]  ;;  %v525_v54 = vld [vmem:[%s1996_s27 + $0x898] sm:$0xff]  ;;  %v528_v57 = vld [vmem:[%s1996_s27 + $0x8b0] sm:$0xff] }
  0xc4   : > { %1422 = vmatprep.subr.bf16.mxu0 %v1421_v3  ;;  %v1441_v3 = vpack.c.bf16 %v530_v60, %v527_v59  ;;  %v477_v16 = vld [vmem:[%s1996_s27 + $0x718] sm:$0xff]  ;;  %v531_v58 = vld [vmem:[%s1996_s27 + $0x8c8] sm:$0xff] }
  0xc5   : > { %839 = vmatmul.mubr.f32.gmra.mrb[6].mxu1 %v2164_v34  ;;  %v420_v34 = vld [vmem:[%s1996_s27 + $0x550] sm:$0xff]  ;;  %v1537_v60 = vpack.c.bf16 %v531_v58, %v528_v57 }
  0xc6   : > { %1488 = vmatpush3.bf16.msra.mxu1 %v1487_v9  ;;  %908 = vmatprep.mubr.f32.mxu1 %v2105_v19  ;;  %v518_v19 = vld [vmem:[%s1996_s27 + $0x860] sm:$0xff]  ;;  %v1497_v40 = vpack.c.bf16 %v423_v35, %v420_v34  ;;  %v1507_v9 = vpack.c.bf16 %v387_v2, %v384_v1  ;;  %v453_v34 = vld [vmem:[%s1996_s27 + $0x658] sm:$0xff] }
  0xc7   : > { %1424 = vmatpush1.bf16.msra.mxu0 %v1423_v10  ;;  %1490 = vmatprep.subr.bf16.mxu1 %v1489_v11  ;;  %v1433_v44 = vpack.c.bf16 %v518_v19, %v515_v36  ;;  %v1443_v10 = vpack.c.bf16 %v529_v4, %v526_v0  ;;  %v1509_v11 = vpack.c.bf16 %v441_v6, %v438_v5  ;;  %v249_v35 = vld [vmem:[#allocation2 + $0x58] sm:$0xff]  ;;  %v504_v19 = vld [vmem:[%s1996_s27 + $0x7f0] sm:$0xff] }
  0xc8   : > { %1426 = vmatprep.subr.bf16.mxu0 %v1425_v17  ;;  %v1445_v17 = vpack.c.bf16 %v536_v8, %v533_v7  ;;  %v1517_v36 = vpack.c.bf16 %v501_v29, %v498_v27  ;;  %v537_v0 = vld [vmem:[%s1996_s27 + $0x8f8] sm:$0xff] }
  0xc9   : > { %v489_v4 = vld [vmem:[%s1996_s27 + $0x778] sm:$0xff] }
  0xca   : > { %1492 = vmatpush3.bf16.msra.mxu1 %v1491_v32  ;;  %v1513_v32 = vpack.c.bf16 %v495_v21, %v492_v20 }
  0xcb   : > { %1428 = vmatpush1.bf16.msra.mxu0 %v1427_v25  ;;  %1494 = vmatprep.subr.bf16.mxu1 %v1493_v26  ;;  %v444_v25 = vld [vmem:[%s1996_s27 + $0x610] sm:$0xff]  ;;  %v447_v26 = vld [vmem:[%s1996_s27 + $0x628] sm:$0xff] }
  0xcc   : > { %1430 = vmatprep.subr.bf16.mxu0 %v1429_v31  ;;  %v1515_v30 = vpack.c.bf16 %v447_v26, %v444_v25  ;;  %v2296_v31 = vld [vmem:[#allocation2 + $0x20] sm:$0xff] }
  0xce   : > { %1496 = vmatpush3.bf16.msra.mxu1 %v1495_v37  ;;  %v507_v37 = vld [vmem:[%s1996_s27 + $0x808] sm:$0xff] }
  0xcf   : > { %1432 = vmatpush1.bf16.msra.mxu0 %v1431_v39  ;;  %1498 = vmatprep.subr.bf16.mxu1 %v1497_v40  ;;  %v1519_v39 = vpack.c.bf16 %v453_v34, %v450_v33  ;;  %v2304_v40 = vld [vmem:[#allocation2 + $0x50] sm:$0xff]  ;;  %v1521_v41 = vpack.c.bf16 %v507_v37, %v504_v19 }
  0xd0   : > { %1434 = vmatprep.subr.bf16.mxu0 %v1433_v44  ;;  %v510_v44 = vld [vmem:[%s1996_s27 + $0x820] sm:$0xff] }
  0xd2   : > { %1500 = vmatpush3.bf16.msra.mxu1 %v1499_v50  ;;  %v1529_v50 = vpack.c.bf16 %v519_v49, %v516_v48 }
  0xd3   : > { %1436 = vmatpush1.bf16.msra.mxu0 %v1435_v51  ;;  %1502 = vmatprep.subr.bf16.mxu1 %v1501_v52  ;;  %v468_v51 = vld [vmem:[%s1996_s27 + $0x6d0] sm:$0xff]  ;;  %v471_v52 = vld [vmem:[%s1996_s27 + $0x6e8] sm:$0xff] }
  0xd4   : > { %1438 = vmatprep.subr.bf16.mxu0 %v1437_v56  ;;  %v1531_v55 = vpack.c.bf16 %v471_v52, %v468_v51  ;;  %v474_v56 = vld [vmem:[%s1996_s27 + $0x700] sm:$0xff] }
  0xd5   : > { %v1535_v59 = vpack.c.bf16 %v477_v16, %v474_v56 }
  0xd6   : > { %1504 = vmatpush3.bf16.msra.mxu1 %v1503_v61  ;;  %v480_v61 = vld [vmem:[%s1996_s27 + $0x730] sm:$0xff] }
  0xd7   : > { %1440 = vmatpush1.bf16.msra.mxu0 %v1439_v62  ;;  %1506 = vmatprep.subr.bf16.mxu1 %v1505_v63  ;;  %v483_v62 = vld [vmem:[%s1996_s27 + $0x748] sm:$0xff]  ;;  %v534_v63 = vld [vmem:[%s1996_s27 + $0x8e0] sm:$0xff] }
  0xd8   : > { %1442 = vmatprep.subr.bf16.mxu0 %v1441_v3  ;;  %v1539_v1 = vpack.c.bf16 %v483_v62, %v480_v61  ;;  %v1541_v2 = vpack.c.bf16 %v537_v0, %v534_v63  ;;  %v486_v3 = vld [vmem:[%s1996_s27 + $0x760] sm:$0xff] }
  0xd9   : > { %v1543_v5 = vpack.c.bf16 %v489_v4, %v486_v3 }
  0xda   : > { %1508 = vmatpush3.bf16.msra.mxu1 %v1507_v9 }
  0xdb   : > { %1444 = vmatpush1.bf16.msra.mxu0 %v1443_v10  ;;  %1510 = vmatprep.subr.bf16.mxu1 %v1509_v11 }
  0xdc   : > { %1446 = vmatprep.subr.bf16.mxu0 %v1445_v17 }
  0xde   : > { %1512 = vmatpush3.bf16.msra.mxu1 %v1511_v22 }
  0xdf   : > { %1448 = vmatpush1.bf16.msra.mxu0 %v1447_v24  ;;  %1545 = vmatprep.subr.bf16.mxu1 %v1513_v32 }
  0xe0   : > { %1514 = vmatprep.subr.bf16.mxu0 %v1513_v32 }
  0xe1   : > { %909 = vmatmul.mubr.f32.vlgmr.msra.gmra.mrb[8].mxu1 %v2150_v18  ;;  %v513_v18 = vld [vmem:[%s1996_s27 + $0x838] sm:$0xff] }
  0xe2   : > { %757 = vmatmul.mubr.f32.vlgmr.msra.gmra.mrb[0].mxu0 %v2296_v31  ;;  %1553 = vmatpush3.bf16.msra.mxu1 %v1515_v30  ;;  %v1525_v46 = vpack.c.bf16 %v513_v18, %v510_v44 }
  0xe3   : > { %1516 = vmatpush3.bf16.msra.mxu0 %v1515_v30  ;;  %762 = vmatprep.mubr.f32.mxu0 %v249_v35 }
  0xe4   : > { %913 = vmatprep.mubr.f32.mxu1 %v2202_v23  ;;  %1518 = vmatprep.subr.bf16.mxu0 %v1517_v36  ;;  %v465_v23 = vld [vmem:[%s1996_s27 + $0x6b8] sm:$0xff] }
  0xe5   : > { %914 = vmatmul.mubr.f32.gmra.mrb[10].mxu1 %v2206_v28  ;;  %1546 = vmatprep.subr.bf16.mxu1 %v1517_v36  ;;  %v1527_v28 = vpack.c.bf16 %v465_v23, %v462_v47 }
  0xe6   : > { %763 = vmatmul.mubr.f32.gmra.mrb[2].mxu0 %v2304_v40  ;;  %1554 = vmatpush3.bf16.msra.mxu1 %v1519_v39 }
  0xe7   : > { %1520 = vmatpush3.bf16.msra.mxu0 %v1519_v39  ;;  %1547 = vmatprep.subr.bf16.mxu1 %v1521_v41 }
  0xe8   : > { %1522 = vmatprep.subr.bf16.mxu0 %v1521_v41  ;;  %983 = vmatprep.mubr.f32.mxu0 %v2215_v38  ;;  %v1533_v38 = vpack.c.bf16 %v525_v54, %v522_v53 }
  0xe9   : > { %988 = vmatprep.mubr.f32.mxu1 %v249_v35 }
  0xea   : > { %1555 = vmatpush3.bf16.msra.mxu1 %v1523_v45 }
  0xeb   : > { %1524 = vmatpush3.bf16.msra.mxu0 %v1523_v45  ;;  %1548 = vmatprep.subr.bf16.mxu1 %v1525_v46 }
  0xec   : > { %1526 = vmatprep.subr.bf16.mxu0 %v1525_v46 }
  0xee   : > { %1556 = vmatpush3.bf16.msra.mxu1 %v1527_v28 }
  0xef   : > { %1528 = vmatpush3.bf16.msra.mxu0 %v1527_v28  ;;  %1549 = vmatprep.subr.bf16.mxu1 %v1529_v50 }
  0xf0   : > { %1530 = vmatprep.subr.bf16.mxu0 %v1529_v50 }
  0xf2   : > { %1557 = vmatpush3.bf16.msra.mxu1 %v1531_v55 }
  0xf3   : > { %1532 = vmatpush3.bf16.msra.mxu0 %v1531_v55  ;;  %1550 = vmatprep.subr.bf16.mxu1 %v1533_v38 }
  0xf4   : > { %1534 = vmatprep.subr.bf16.mxu0 %v1533_v38 }
  0xf6   : > { %1558 = vmatpush3.bf16.msra.mxu1 %v1535_v59 }
  0xf7   : > { %1536 = vmatpush3.bf16.msra.mxu0 %v1535_v59  ;;  %1551 = vmatprep.subr.bf16.mxu1 %v1537_v60 }
  0xf8   : > { %1538 = vmatprep.subr.bf16.mxu0 %v1537_v60 }
  0xfa   : > { %1559 = vmatpush3.bf16.msra.mxu1 %v1539_v1 }
  0xfb   : > { %1540 = vmatpush3.bf16.msra.mxu0 %v1539_v1  ;;  %1552 = vmatprep.subr.bf16.mxu1 %v1541_v2 }
  0xfc   : > { %1542 = vmatprep.subr.bf16.mxu0 %v1541_v2 }
  0xfe   : > { %1560 = vmatpush3.bf16.msra.mxu1 %v1543_v5 }
  0xff   : > { %1544 = vmatpush3.bf16.msra.mxu0 %v1543_v5 }
 0x101   : > { %989 = vmatmul.mubr.f32.vlgmr.msra.gmra.mrb[12].mxu1 %v2304_v40 }
 0x102   : > { %984 = vmatmul.mubr.f32.vlgmr.msra.gmra.mrb[4].mxu0 %v2296_v31 }
 0x174   : > { %v604_v6 = vpop.f32.mrb[0].mxu1 }
 0x175   : > { %v606_v7 = vpop.f32.mrb[1].mxu1 }
 0x178   : > { %v610_v8 = vpop.f32.mrb[2].mxu1 }
 0x179   : > { %v612_v9 = vpop.f32.mrb[3].mxu1 }
 0x194   : > { %v1175_v10 = vpop.f32.mrb[4].mxu1 }
 0x195   : > { %v1176_v11 = vpop.f32.mrb[5].mxu1 }
 0x196   : > { %v1177_v12 = vadd.f32 %v1176_v11, %v1175_v10 }
 0x198   : > { %v1178_v13 = vpop.f32.mrb[6].mxu1 }
 0x199   : > { %v1179_v14 = vpop.f32.mrb[7].mxu1 }
 0x19a   : > { %v1180_v17 = vadd.f32 %v1179_v14, %v1178_v13 }
 0x1b4   : > { %v1213_v15 = vpop.f32.mrb[8].mxu1 }
 0x1b5   : > { %v758_v20 = vpop.f32.mrb[0].mxu0  ;;  %v1214_v21 = vpop.f32.mrb[9].mxu1 }
 0x1b6   : > { %v1561_v22 = vadd.f32 %v758_v20, %v604_v6  ;;  %v760_v24 = vpop.f32.mrb[1].mxu0  ;;  %v1215_v32 = vadd.f32 %v1214_v21, %v1213_v15 }
 0x1b7   : > { %v1562_v25 = vadd.f32 %v760_v24, %v606_v7 }
 0x1b8   : > { %v911_v26 = vadd.f32 %v1215_v32, %v1177_v12  ;;  %v1216_v27 = vpop.f32.mrb[10].mxu1  ;;  %1000 = vst [vmem:[%s215_s20] sm:$0xff] %v1561_v22 }
 0x1b9   : > { %v764_v29 = vpop.f32.mrb[2].mxu0  ;;  %v1217_v30 = vpop.f32.mrb[11].mxu1  ;;  %1001 = vst [vmem:[%s215_s20 + $0x8] sm:$0xff] %v1562_v25 }
 0x1ba   : > { %v1563_v31 = vadd.f32 %v764_v29, %v610_v8  ;;  %v766_v33 = vpop.f32.mrb[3].mxu0  ;;  %v1218_v34 = vadd.f32 %v1217_v30, %v1216_v27 }
 0x1bb   : > { %v1564_v35 = vadd.f32 %v766_v33, %v612_v9 }
 0x1bc   : > { %v916_v36 = vadd.f32 %v1218_v34, %v1180_v17  ;;  %1003 = vst [vmem:[%s215_s20 + $0x18] sm:$0xff] %v1563_v31 }
 0x1bd   : > { %1004 = vst [vmem:[%s215_s20 + $0x20] sm:$0xff] %v1564_v35 }
 0x1d4   : > { %v1254_v19 = vpop.f32.mrb[12].mxu1 }
 0x1d5   : > { %v1251_v37 = vpop.f32.mrb[4].mxu0  ;;  %v1255_v39 = vpop.f32.mrb[13].mxu1 }
 0x1d6   : > { %v1252_v40 = vpop.f32.mrb[5].mxu0  ;;  %v1256_v41 = vadd.f32 %v1255_v39, %v1254_v19 }
 0x1d7   : > { %v1253_v42 = vadd.f32 %v1252_v40, %v1251_v37 }
 0x1d8   : > { %v991_v43 = vadd.f32 %v1256_v41, %v916_v36 }
 0x1d9   : > { %v986_v44 = vadd.f32 %v1253_v42, %v911_v26 }
 0x1da   : > { %1005 = vst [vmem:[%s215_s20 + $0x28] sm:$0xff] %v991_v43 }
 0x1db   : > { %1002 = vst [vmem:[%s215_s20 + $0x10] sm:$0xff] %v986_v44 }
 0x1dc   : > { %1724 = shalt.err (!%p1721_p8)
}
 0x1dd   : > { %s1725_s25 = scalar_lea.hbm %s2339_s19, 768  ;;  %s1729_s4 = scalar_lea.hbm %s2392_s2, 1536 }
 0x1de   : > { %p1726_p0 = scmp.ne.s32.totalorder %s2339_s19, %s1725_s25  ;;  %p1730_p12 = scmp.lt.u32.totalorder %s2339_s19, %s2392_s2 }
 0x1df   : > { %p1731_p2 = scmp.lt.u32.totalorder %s1729_s4, %s1725_s25  ;;  %p1733_p10 = scmp.lt.u32.totalorder %s1725_s25, %s2339_s19 }
 0x1e0   : > { %p1727_p4 = pnand %p1726_p0, %p2413_p11 }
 0x1e1   : > { %p1732_p9 = por %p1731_p2, %p1730_p12 }
 0x1e2   : > { %p1728_p6 = pneg %p1727_p4 }
 0x1e3   : > { %p1734_p13 = por %p1733_p10, %p1732_p9 }
 0x1e5   : > { %p1735_p5 = pnand %p1734_p13, %p1728_p6 }
 0x1e7   : > { %1738 = shalt.err (!%p1735_p5)
}
 0x1e8   : > { %s1806_s18 = smov 384   ;;  %s1807_s20 = smov 768  }
 0x1e9   : > { %s1808_s23 = smov 24  }
 0x1ea   : > { %1578 = dma.vmem_to_hbm [thread:$0]  (%p2413_p11), %s2341_s16, 768, %s2339_s19, %s1007_s7, %s1806_s18, %s1807_s20, %s1808_s23  }
 0x1eb PF: > { %s1038_s26 = sand.u32 1, %s1777_s9   ;;  %p2414_p1 = scmp.ne.s32.totalorder %s2403_s22, 0 }
 0x1ec   : > { %p2415_p3 = scmp.ge.s32.totalorder %s1797_s14, 2  ;;  %s1039_s15 = scalar_lea.sflag [#allocation4], %s1038_s26 }
 0x1ee   : > { %p1589_p7 = pnand %p2415_p3, %p2414_p1 }
 0x1f0   : > { %1772 = dma.done.wait (!%p1589_p7), %s1039_s15, 768  }
 0x1f1   : > { %1774 = vsyncadd (!%p1589_p7), %s1039_s15, 4294966528  ;;  %s19_s14 = sadd.s32 1, %s1797_s14   ;;  %s2416_s9 = smov %s1781_s10 }
 0x1f2   : > { %p16_p8 = scmp.ge.s32.totalorder %s19_s14, 4   ;;  %s2417_s10 = smov %s1785_s11 }
 0x1f3   : > { %s2418_s11 = smov %s1952_s29  ;;  %s2419_s12 = smov %s1793_s13 }
 0x1f4   : > { %s2420_s13 = smov %s2422_s28  ;;  %18 = sbr.rel (!%p16_p8) target bundleno = 7 (0x7), region = 83 }
 0x1fb   :  { %1044 = vsyncpa [#allocation3], 1 }
 0x1fc   :  { %1046 = vsyncpa [#allocation3 + $0x1], 1 }
 0x1fd   :  { %1047 = vsyncpa [#allocation6], 1 }
 0x1fe   :  { %1049 = vsyncpa [#allocation6 + $0x1], 1 }
 0x1ff   :  { %1050 = vsyncpa [#allocation4], 1 }
 0x200   :  { %1052 = vsyncpa [#allocation4 + $0x1], 1 }

</bundles_post_ra>
